<compile_context>
chip_gen: v6e
topology: v6e:2x2x1
jax: 0.10.0
libtpu: 0.0.40
codegen_flags: <defaults>
</compile_context>

<pallas_src>
import functools

import jax
import jax.numpy as jnp
from jax import lax
from jax.experimental import pallas as pl
from jax.experimental.pallas import tpu as pltpu


def siglip_attn_kernel(x_ref, wqkv_ref, bqkv_ref, wo_ref, bo_ref,
                       out_ref, attnw_ref, qkv_ref, ctx_ref,
                       *, scale, num_heads, head_dim, n_valid):
    h = pl.program_id(1)
    H, D = num_heads, head_dim
    dt = ctx_ref.dtype
    n_pad = ctx_ref.shape[0]          # padded sequence length

    # ---- Fused QKV projection: once per batch element (h == 0) ------------
    @pl.when(h == 0)
    def _():
        x = x_ref[0]                                                  # (Np, E)
        qkv = (jnp.dot(x, wqkv_ref[...], preferred_element_type=jnp.float32)
               + bqkv_ref[...].astype(jnp.float32)).astype(dt)        # (Np, 3E)
        # Scatter into a head-major scratch with STATIC lane slices
        # (unrolled at trace time); per-head reads below are then simple
        # dynamic leading-axis indexing.
        for i in range(3 * H):
            qkv_ref[i] = qkv[:, i * D:(i + 1) * D]

    # ---- Per-head attention ------------------------------------------------
    q = qkv_ref[h]                      # (Np, D)
    k = qkv_ref[H + h]                  # (Np, D)
    v = qkv_ref[2 * H + h]              # (Np, D)

    # Scaled scores: Q @ K^T -> (Np, Np), f32 MXU accumulation.  These *are*
    # the attn_weights this module returns (dropout p=0.0 is the identity).
    scores = lax.dot_general(q, k, (((1,), (1,)), ((), ())),
                             preferred_element_type=jnp.float32) * scale
    attnw_ref[0, 0] = scores.astype(attnw_ref.dtype)

    # Mask padded key columns before the softmax (padded x rows project to the
    # bias, so they must not receive probability mass).
    if n_valid < n_pad:
        col = lax.broadcasted_iota(jnp.int32, scores.shape, 1)
        scores = jnp.where(col < n_valid, scores, -jnp.inf)

    # Softmax in f32 (torch.softmax(..., dtype=float32)), exact normalization.
    m = jnp.max(scores, axis=-1, keepdims=True)
    ex = jnp.exp(scores - m)
    probs = (ex / jnp.sum(ex, axis=-1, keepdims=True)).astype(dt)

    # Context for this head: (Np, Np) @ (Np, D) -> (Np, D).
    ctx = jnp.dot(probs, v, preferred_element_type=jnp.float32).astype(dt)

    # Place this head's context at its lane offset h*D using statically
    # unrolled pl.when blocks (static slice offsets; exactly one branch runs).
    for i in range(H):
        @pl.when(h == i)
        def _(i=i):
            ctx_ref[:, i * D:(i + 1) * D] = ctx

    # ---- Output projection: single full-depth matmul at the last head -----
    @pl.when(h == H - 1)
    def _():
        out = (jnp.dot(ctx_ref[...], wo_ref[...],
                       preferred_element_type=jnp.float32)
               + bo_ref[...].astype(jnp.float32))
        out_ref[0] = out.astype(out_ref.dtype)


def siglip_attention(x, params, num_heads):
    """x: (B, N, E).  params: wq/wk/wv/wo as (E, E) in (in, out) layout
    (already transposed from PyTorch's (out, in)); biases as (1, E)."""
    B, N, E = x.shape
    H = num_heads
    D = E // H
    scale = 1.0 / (D ** 0.5)

    # Pad N to a multiple of 128 -> lane-dense (unmasked) attn-weight stores
    # and (8,128)-aligned tiles everywhere.
    n_pad = ((N + 127) // 128) * 128
    x_p = jnp.pad(x, ((0, 0), (0, n_pad - N), (0, 0))) if n_pad != N else x

    # Wrapper-side layout plumbing: fuse Q/K/V weights into one wide matrix.
    wqkv = jnp.concatenate([params["wq"], params["wk"], params["wv"]], axis=1)  # (E, 3E)
    bqkv = jnp.concatenate([params["bq"], params["bk"], params["bv"]], axis=1)  # (1, 3E)
    wo = params["wo"]                                                           # (E, E)
    bo = params["bo"]                                                           # (1, E)

    kernel = functools.partial(siglip_attn_kernel, scale=scale, num_heads=H,
                               head_dim=D, n_valid=N)

    const = lambda b, h: (0, 0)   # resident weights: loaded from HBM once

    out, attn_w = pl.pallas_call(
        kernel,
        out_shape=(
            jax.ShapeDtypeStruct((B, n_pad, E), x.dtype),
            jax.ShapeDtypeStruct((B, H, n_pad, n_pad), x.dtype),
        ),
        grid_spec=pltpu.PrefetchScalarGridSpec(
            num_scalar_prefetch=0,
            grid=(B, H),
            in_specs=[
                pl.BlockSpec((1, n_pad, E), lambda b, h: (b, 0, 0)),  # x (resident across h)
                pl.BlockSpec((E, 3 * E), const),                      # fused Wqkv (resident)
                pl.BlockSpec((1, 3 * E), const),                      # fused bias (resident)
                pl.BlockSpec((E, E), const),                          # Wo (resident)
                pl.BlockSpec((1, E), const),                          # bo (resident)
            ],
            out_specs=[
                pl.BlockSpec((1, n_pad, E), lambda b, h: (b, 0, 0)),         # out (written at h==H-1)
                pl.BlockSpec((1, 1, n_pad, n_pad), lambda b, h: (b, h, 0, 0)),  # attn weights tile
            ],
            scratch_shapes=[
                pltpu.VMEM((3 * H, n_pad, D), x.dtype),   # head-major QKV
                pltpu.VMEM((n_pad, E), x.dtype),          # assembled context
            ],
        ),
        compiler_params=pltpu.CompilerParams(
            # Batch axis parallel (megacore / v7x dual-TC: keep B >= 2),
            # head axis carries the QKV / ctx scratches -> arbitrary.
            dimension_semantics=("parallel", "arbitrary"),
            vmem_limit_bytes=48 * 1024 * 1024,
        ),
    )(x_p, wqkv, bqkv, wo, bo)

    return out[:, :N, :], attn_w[:, :, :N, :N]


def reference(x, params, num_heads):
    """Plain-JAX mirror of the PyTorch forward for validation."""
    B, N, E = x.shape
    D = E // num_heads
    scale = 1.0 / (D ** 0.5)
    q = x @ params["wq"] + params["bq"]
    k = x @ params["wk"] + params["bk"]
    v = x @ params["wv"] + params["bv"]
    q = q.reshape(B, N, num_heads, D).transpose(0, 2, 1, 3)
    k = k.reshape(B, N, num_heads, D).transpose(0, 2, 1, 3)
    v = v.reshape(B, N, num_heads, D).transpose(0, 2, 1, 3)
    scores = jnp.einsum('bhqd,bhkd->bhqk', q, k) * scale
    probs = jax.nn.softmax(scores.astype(jnp.float32), axis=-1).astype(x.dtype)
    ctx = jnp.einsum('bhqk,bhkd->bhqd', probs, v)
    ctx = ctx.transpose(0, 2, 1, 3).reshape(B, N, E)
    out = ctx @ params["wo"] + params["bo"]
    # This module returns the *scaled raw scores* as attn_weights (dropout p=0).
    return out, scores


if __name__ == "__main__":
    # Small config consistent with the module: hidden_size=32, num_heads=4.
    B, N, E, H = 2, 16, 32, 4
    key = jax.random.PRNGKey(0)
    keys = jax.random.split(key, 9)

    def linear_params(kw, kb):
        # Deterministic init; stored directly as (in, out) for the kernel.
        w = jax.random.normal(kw, (E, E), jnp.float32) * 0.02
        b = jax.random.normal(kb, (1, E), jnp.float32) * 0.02
        return w, b

    wq, bq = linear_params(keys[0], keys[1])
    wk, bk = linear_params(keys[2], keys[3])
    wv, bv = linear_params(keys[4], keys[5])
    wo, bo = linear_params(keys[6], keys[7])
    params = dict(wq=wq, bq=bq, wk=wk, bk=bk, wv=wv, bv=bv, wo=wo, bo=bo)

    x = jax.random.normal(keys[8], (B, N, E), jnp.float32)

    out, attn_w = siglip_attention(x, params, num_heads=H)
    out = jax.block_until_ready(out)
    attn_w = jax.block_until_ready(attn_w)

    out_ref, attn_ref = reference(x, params, num_heads=H)
    assert out.shape == (B, N, E)
    assert attn_w.shape == (B, H, N, N)
    assert jnp.allclose(attn_w, attn_ref, atol=1e-3, rtol=1e-2), \
        float(jnp.max(jnp.abs(attn_w - attn_ref)))
    assert jnp.allclose(out, out_ref, atol=1e-3, rtol=1e-2), \
        float(jnp.max(jnp.abs(out - out_ref)))

    print("KERNEL_OK")
</pallas_src>

<mosaic_0001>
module attributes {stable_mosaic.version = 11 : i64} {
  func.func @siglip_attn_kernel(%arg0: i32, %arg1: i32, %arg2: memref<1x128x32xf32, #tpu.memory_space<vmem>>, %arg3: memref<32x96xf32, #tpu.memory_space<vmem>>, %arg4: memref<1x96xf32, #tpu.memory_space<vmem>>, %arg5: memref<32x32xf32, #tpu.memory_space<vmem>>, %arg6: memref<1x32xf32, #tpu.memory_space<vmem>>, %arg7: memref<1x128x32xf32, #tpu.memory_space<vmem>>, %arg8: memref<1x1x128x128xf32, #tpu.memory_space<vmem>>, %arg9: memref<12x128x8xf32, #tpu.memory_space<vmem>>, %arg10: memref<128x32xf32, #tpu.memory_space<vmem>>) attributes {dimension_semantics = [#tpu.dimension_semantics<parallel>, #tpu.dimension_semantics<arbitrary>], iteration_bounds = array<i64: 2, 4>, scalar_prefetch = 0 : i64, scratch_operands = 2 : i64, tpu.core_type = #tpu.core_type<tc>, window_params = [{transform_indices = @transform_0, window_bounds = array<i64: 1, 128, 32>}, {pipeline_mode = #tpu.pipeline_mode<synchronous>, transform_indices = @transform_1, window_bounds = array<i64: 32, 96>}, {pipeline_mode = #tpu.pipeline_mode<synchronous>, transform_indices = @transform_2, window_bounds = array<i64: 1, 96>}, {pipeline_mode = #tpu.pipeline_mode<synchronous>, transform_indices = @transform_3, window_bounds = array<i64: 32, 32>}, {pipeline_mode = #tpu.pipeline_mode<synchronous>, transform_indices = @transform_4, window_bounds = array<i64: 1, 32>}, {transform_indices = @transform_5, window_bounds = array<i64: 1, 128, 32>}, {transform_indices = @transform_6, window_bounds = array<i64: 1, 1, 128, 128>}]} {
    %c0_i32 = arith.constant 0 : i32
    %0 = arith.cmpi eq, %arg1, %c0_i32 : i32
    %1 = arith.extui %0 : i1 to i32
    %c0_i32_0 = arith.constant 0 : i32
    %2 = arith.cmpi ne, %1, %c0_i32_0 : i32
    scf.if %2 {
      %c0_22 = arith.constant 0 : index
      %c0_23 = arith.constant 0 : index
      %c0_24 = arith.constant 0 : index
      %50 = vector.load %arg2[%c0_22, %c0_23, %c0_24] : memref<1x128x32xf32, #tpu.memory_space<vmem>>, vector<1x128x32xf32>
      %51 = vector.shape_cast %50 : vector<1x128x32xf32> to vector<128x32xf32>
      %c0_25 = arith.constant 0 : index
      %c0_26 = arith.constant 0 : index
      %52 = vector.load %arg3[%c0_25, %c0_26] : memref<32x96xf32, #tpu.memory_space<vmem>>, vector<32x96xf32>
      %cst_27 = arith.constant dense<0.000000e+00> : vector<128x96xf32>
      %53 = tpu.matmul %51, %52, %cst_27 {dimension_numbers = #tpu.dot_dimension_numbers<[1], [0], [0], [1], [0, 0, 1, 1], [], []>} : vector<128x32xf32>, vector<32x96xf32>, vector<128x96xf32> -> vector<128x96xf32>
      %c0_28 = arith.constant 0 : index
      %c0_29 = arith.constant 0 : index
      %54 = vector.load %arg4[%c0_28, %c0_29] : memref<1x96xf32, #tpu.memory_space<vmem>>, vector<1x96xf32>
      %55 = vector.broadcast %54 : vector<1x96xf32> to vector<128x96xf32>
      %56 = arith.addf %53, %55 : vector<128x96xf32>
      %57 = vector.extract_strided_slice %56 {offsets = [0, 0], sizes = [128, 8], strides = [1, 1]} : vector<128x96xf32> to vector<128x8xf32>
      %c0_30 = arith.constant 0 : index
      %c0_31 = arith.constant 0 : index
      %c0_32 = arith.constant 0 : index
      %58 = vector.load %arg9[%c0_30, %c0_31, %c0_32] : memref<12x128x8xf32, #tpu.memory_space<vmem>>, vector<1x128x8xf32>
      %59 = vector.shape_cast %58 : vector<1x128x8xf32> to vector<128x8xf32>
      %60 = vector.shape_cast %57 : vector<128x8xf32> to vector<1x128x8xf32>
      tpu.vector_store %arg9[%c0_30, %c0_31, %c0_32], %60 {strides = array<i32>} : memref<12x128x8xf32, #tpu.memory_space<vmem>>, vector<1x128x8xf32>,
      %61 = vector.extract_strided_slice %56 {offsets = [0, 8], sizes = [128, 8], strides = [1, 1]} : vector<128x96xf32> to vector<128x8xf32>
      %c1 = arith.constant 1 : index
      %c0_33 = arith.constant 0 : index
      %c0_34 = arith.constant 0 : index
      %62 = vector.load %arg9[%c1, %c0_33, %c0_34] : memref<12x128x8xf32, #tpu.memory_space<vmem>>, vector<1x128x8xf32>
      %63 = vector.shape_cast %62 : vector<1x128x8xf32> to vector<128x8xf32>
      %64 = vector.shape_cast %61 : vector<128x8xf32> to vector<1x128x8xf32>
      tpu.vector_store %arg9[%c1, %c0_33, %c0_34], %64 {strides = array<i32>} : memref<12x128x8xf32, #tpu.memory_space<vmem>>, vector<1x128x8xf32>,
      %65 = vector.extract_strided_slice %56 {offsets = [0, 16], sizes = [128, 8], strides = [1, 1]} : vector<128x96xf32> to vector<128x8xf32>
      %c2 = arith.constant 2 : index
      %c0_35 = arith.constant 0 : index
      %c0_36 = arith.constant 0 : index
      %66 = vector.load %arg9[%c2, %c0_35, %c0_36] : memref<12x128x8xf32, #tpu.memory_space<vmem>>, vector<1x128x8xf32>
      %67 = vector.shape_cast %66 : vector<1x128x8xf32> to vector<128x8xf32>
      %68 = vector.shape_cast %65 : vector<128x8xf32> to vector<1x128x8xf32>
      tpu.vector_store %arg9[%c2, %c0_35, %c0_36], %68 {strides = array<i32>} : memref<12x128x8xf32, #tpu.memory_space<vmem>>, vector<1x128x8xf32>,
      %69 = vector.extract_strided_slice %56 {offsets = [0, 24], sizes = [128, 8], strides = [1, 1]} : vector<128x96xf32> to vector<128x8xf32>
      %c3 = arith.constant 3 : index
      %c0_37 = arith.constant 0 : index
      %c0_38 = arith.constant 0 : index
      %70 = vector.load %arg9[%c3, %c0_37, %c0_38] : memref<12x128x8xf32, #tpu.memory_space<vmem>>, vector<1x128x8xf32>
      %71 = vector.shape_cast %70 : vector<1x128x8xf32> to vector<128x8xf32>
      %72 = vector.shape_cast %69 : vector<128x8xf32> to vector<1x128x8xf32>
      tpu.vector_store %arg9[%c3, %c0_37, %c0_38], %72 {strides = array<i32>} : memref<12x128x8xf32, #tpu.memory_space<vmem>>, vector<1x128x8xf32>,
      %73 = vector.extract_strided_slice %56 {offsets = [0, 32], sizes = [128, 8], strides = [1, 1]} : vector<128x96xf32> to vector<128x8xf32>
      %c4 = arith.constant 4 : index
      %c0_39 = arith.constant 0 : index
      %c0_40 = arith.constant 0 : index
      %74 = vector.load %arg9[%c4, %c0_39, %c0_40] : memref<12x128x8xf32, #tpu.memory_space<vmem>>, vector<1x128x8xf32>
      %75 = vector.shape_cast %74 : vector<1x128x8xf32> to vector<128x8xf32>
      %76 = vector.shape_cast %73 : vector<128x8xf32> to vector<1x128x8xf32>
      tpu.vector_store %arg9[%c4, %c0_39, %c0_40], %76 {strides = array<i32>} : memref<12x128x8xf32, #tpu.memory_space<vmem>>, vector<1x128x8xf32>,
      %77 = vector.extract_strided_slice %56 {offsets = [0, 40], sizes = [128, 8], strides = [1, 1]} : vector<128x96xf32> to vector<128x8xf32>
      %c5 = arith.constant 5 : index
      %c0_41 = arith.constant 0 : index
      %c0_42 = arith.constant 0 : index
      %78 = vector.load %arg9[%c5, %c0_41, %c0_42] : memref<12x128x8xf32, #tpu.memory_space<vmem>>, vector<1x128x8xf32>
      %79 = vector.shape_cast %78 : vector<1x128x8xf32> to vector<128x8xf32>
      %80 = vector.shape_cast %77 : vector<128x8xf32> to vector<1x128x8xf32>
      tpu.vector_store %arg9[%c5, %c0_41, %c0_42], %80 {strides = array<i32>} : memref<12x128x8xf32, #tpu.memory_space<vmem>>, vector<1x128x8xf32>,
      %81 = vector.extract_strided_slice %56 {offsets = [0, 48], sizes = [128, 8], strides = [1, 1]} : vector<128x96xf32> to vector<128x8xf32>
      %c6 = arith.constant 6 : index
      %c0_43 = arith.constant 0 : index
      %c0_44 = arith.constant 0 : index
      %82 = vector.load %arg9[%c6, %c0_43, %c0_44] : memref<12x128x8xf32, #tpu.memory_space<vmem>>, vector<1x128x8xf32>
      %83 = vector.shape_cast %82 : vector<1x128x8xf32> to vector<128x8xf32>
      %84 = vector.shape_cast %81 : vector<128x8xf32> to vector<1x128x8xf32>
      tpu.vector_store %arg9[%c6, %c0_43, %c0_44], %84 {strides = array<i32>} : memref<12x128x8xf32, #tpu.memory_space<vmem>>, vector<1x128x8xf32>,
      %85 = vector.extract_strided_slice %56 {offsets = [0, 56], sizes = [128, 8], strides = [1, 1]} : vector<128x96xf32> to vector<128x8xf32>
      %c7 = arith.constant 7 : index
      %c0_45 = arith.constant 0 : index
      %c0_46 = arith.constant 0 : index
      %86 = vector.load %arg9[%c7, %c0_45, %c0_46] : memref<12x128x8xf32, #tpu.memory_space<vmem>>, vector<1x128x8xf32>
      %87 = vector.shape_cast %86 : vector<1x128x8xf32> to vector<128x8xf32>
      %88 = vector.shape_cast %85 : vector<128x8xf32> to vector<1x128x8xf32>
      tpu.vector_store %arg9[%c7, %c0_45, %c0_46], %88 {strides = array<i32>} : memref<12x128x8xf32, #tpu.memory_space<vmem>>, vector<1x128x8xf32>,
      %89 = vector.extract_strided_slice %56 {offsets = [0, 64], sizes = [128, 8], strides = [1, 1]} : vector<128x96xf32> to vector<128x8xf32>
      %c8 = arith.constant 8 : index
      %c0_47 = arith.constant 0 : index
      %c0_48 = arith.constant 0 : index
      %90 = vector.load %arg9[%c8, %c0_47, %c0_48] : memref<12x128x8xf32, #tpu.memory_space<vmem>>, vector<1x128x8xf32>
      %91 = vector.shape_cast %90 : vector<1x128x8xf32> to vector<128x8xf32>
      %92 = vector.shape_cast %89 : vector<128x8xf32> to vector<1x128x8xf32>
      tpu.vector_store %arg9[%c8, %c0_47, %c0_48], %92 {strides = array<i32>} : memref<12x128x8xf32, #tpu.memory_space<vmem>>, vector<1x128x8xf32>,
      %93 = vector.extract_strided_slice %56 {offsets = [0, 72], sizes = [128, 8], strides = [1, 1]} : vector<128x96xf32> to vector<128x8xf32>
      %c9 = arith.constant 9 : index
      %c0_49 = arith.constant 0 : index
      %c0_50 = arith.constant 0 : index
      %94 = vector.load %arg9[%c9, %c0_49, %c0_50] : memref<12x128x8xf32, #tpu.memory_space<vmem>>, vector<1x128x8xf32>
      %95 = vector.shape_cast %94 : vector<1x128x8xf32> to vector<128x8xf32>
      %96 = vector.shape_cast %93 : vector<128x8xf32> to vector<1x128x8xf32>
      tpu.vector_store %arg9[%c9, %c0_49, %c0_50], %96 {strides = array<i32>} : memref<12x128x8xf32, #tpu.memory_space<vmem>>, vector<1x128x8xf32>,
      %97 = vector.extract_strided_slice %56 {offsets = [0, 80], sizes = [128, 8], strides = [1, 1]} : vector<128x96xf32> to vector<128x8xf32>
      %c10 = arith.constant 10 : index
      %c0_51 = arith.constant 0 : index
      %c0_52 = arith.constant 0 : index
      %98 = vector.load %arg9[%c10, %c0_51, %c0_52] : memref<12x128x8xf32, #tpu.memory_space<vmem>>, vector<1x128x8xf32>
      %99 = vector.shape_cast %98 : vector<1x128x8xf32> to vector<128x8xf32>
      %100 = vector.shape_cast %97 : vector<128x8xf32> to vector<1x128x8xf32>
      tpu.vector_store %arg9[%c10, %c0_51, %c0_52], %100 {strides = array<i32>} : memref<12x128x8xf32, #tpu.memory_space<vmem>>, vector<1x128x8xf32>,
      %101 = vector.extract_strided_slice %56 {offsets = [0, 88], sizes = [128, 8], strides = [1, 1]} : vector<128x96xf32> to vector<128x8xf32>
      %c11 = arith.constant 11 : index
      %c0_53 = arith.constant 0 : index
      %c0_54 = arith.constant 0 : index
      %102 = vector.load %arg9[%c11, %c0_53, %c0_54] : memref<12x128x8xf32, #tpu.memory_space<vmem>>, vector<1x128x8xf32>
      %103 = vector.shape_cast %102 : vector<1x128x8xf32> to vector<128x8xf32>
      %104 = vector.shape_cast %101 : vector<128x8xf32> to vector<1x128x8xf32>
      tpu.vector_store %arg9[%c11, %c0_53, %c0_54], %104 {strides = array<i32>} : memref<12x128x8xf32, #tpu.memory_space<vmem>>, vector<1x128x8xf32>,
    } else {
    }
    %3 = arith.index_cast %arg1 : i32 to index
    %c0 = arith.constant 0 : index
    %c0_1 = arith.constant 0 : index
    %4 = vector.load %arg9[%3, %c0, %c0_1] : memref<12x128x8xf32, #tpu.memory_space<vmem>>, vector<1x128x8xf32>
    %5 = vector.shape_cast %4 : vector<1x128x8xf32> to vector<128x8xf32>
    %c4_i32 = arith.constant 4 : i32
    %6 = arith.addi %c4_i32, %arg1 : i32
    %7 = arith.index_cast %6 : i32 to index
    %c0_2 = arith.constant 0 : index
    %c0_3 = arith.constant 0 : index
    %8 = vector.load %arg9[%7, %c0_2, %c0_3] : memref<12x128x8xf32, #tpu.memory_space<vmem>>, vector<1x128x8xf32>
    %9 = vector.shape_cast %8 : vector<1x128x8xf32> to vector<128x8xf32>
    %c8_i32 = arith.constant 8 : i32
    %10 = arith.addi %c8_i32, %arg1 : i32
    %11 = arith.index_cast %10 : i32 to index
    %c0_4 = arith.constant 0 : index
    %c0_5 = arith.constant 0 : index
    %12 = vector.load %arg9[%11, %c0_4, %c0_5] : memref<12x128x8xf32, #tpu.memory_space<vmem>>, vector<1x128x8xf32>
    %13 = vector.shape_cast %12 : vector<1x128x8xf32> to vector<128x8xf32>
    %cst = arith.constant dense<0.000000e+00> : vector<128x128xf32>
    %14 = tpu.matmul %5, %9, %cst {dimension_numbers = #tpu.dot_dimension_numbers<[1], [1], [0], [0], [0, 0, 1, 0], [], []>} : vector<128x8xf32>, vector<128x8xf32>, vector<128x128xf32> -> vector<128x128xf32>
    %cst_6 = arith.constant 0.353553385 : f32
    %15 = vector.broadcast %cst_6 : f32 to vector<128x128xf32>
    %16 = arith.mulf %14, %15 : vector<128x128xf32>
    %c0_7 = arith.constant 0 : index
    %c0_8 = arith.constant 0 : index
    %c0_9 = arith.constant 0 : index
    %c0_10 = arith.constant 0 : index
    %17 = vector.load %arg8[%c0_7, %c0_8, %c0_9, %c0_10] : memref<1x1x128x128xf32, #tpu.memory_space<vmem>>, vector<1x1x128x128xf32>
    %18 = vector.shape_cast %17 : vector<1x1x128x128xf32> to vector<128x128xf32>
    %19 = vector.shape_cast %16 : vector<128x128xf32> to vector<1x1x128x128xf32>
    tpu.vector_store %arg8[%c0_7, %c0_8, %c0_9, %c0_10], %19 {strides = array<i32>} : memref<1x1x128x128xf32, #tpu.memory_space<vmem>>, vector<1x1x128x128xf32>,
    %20 = tpu.iota {dimensions = array<i32: 1>} : vector<128x128xi32>
    %c16_i32 = arith.constant 16 : i32
    %21 = vector.broadcast %c16_i32 : i32 to vector<128x128xi32>
    %22 = arith.cmpi slt, %20, %21 : vector<128x128xi32>
    %cst_11 = arith.constant 0xFF800000 : f32
    %23 = vector.broadcast %cst_11 : f32 to vector<128x128xf32>
    %24 = arith.select %22, %16, %23 : vector<128x128xi1>, vector<128x128xf32>
    %cst_12 = arith.constant dense<0xFF800000> : vector<128xf32>
    %25 = vector.multi_reduction <maximumf>, %24, %cst_12 [1] : vector<128x128xf32> to vector<128xf32>
    %26 = vector.shape_cast %25 : vector<128xf32> to vector<128x1xf32>
    %27 = vector.broadcast %26 : vector<128x1xf32> to vector<128x128xf32>
    %28 = arith.subf %24, %27 : vector<128x128xf32>
    %29 = math.exp %28 : vector<128x128xf32>
    %cst_13 = arith.constant dense<0.000000e+00> : vector<128xf32>
    %30 = vector.multi_reduction <add>, %29, %cst_13 [1] : vector<128x128xf32> to vector<128xf32>
    %31 = vector.shape_cast %30 : vector<128xf32> to vector<128x1xf32>
    %32 = vector.broadcast %31 : vector<128x1xf32> to vector<128x128xf32>
    %33 = arith.divf %29, %32 : vector<128x128xf32>
    %cst_14 = arith.constant dense<0.000000e+00> : vector<128x8xf32>
    %34 = tpu.matmul %33, %13, %cst_14 {dimension_numbers = #tpu.dot_dimension_numbers<[1], [0], [0], [1], [0, 0, 1, 1], [], []>} : vector<128x128xf32>, vector<128x8xf32>, vector<128x8xf32> -> vector<128x8xf32>
    %c0_i32_15 = arith.constant 0 : i32
    %35 = arith.cmpi eq, %arg1, %c0_i32_15 : i32
    %36 = arith.extui %35 : i1 to i32
    %c0_i32_16 = arith.constant 0 : i32
    %37 = arith.cmpi ne, %36, %c0_i32_16 : i32
    scf.if %37 {
      %c0_22 = arith.constant 0 : index
      %c0_23 = arith.constant 0 : index
      %50 = vector.load %arg10[%c0_22, %c0_23] : memref<128x32xf32, #tpu.memory_space<vmem>>, vector<128x8xf32>
      tpu.vector_store %arg10[%c0_22, %c0_23], %34 {strides = array<i32>} : memref<128x32xf32, #tpu.memory_space<vmem>>, vector<128x8xf32>,
    } else {
    }
    %c1_i32 = arith.constant 1 : i32
    %38 = arith.cmpi eq, %arg1, %c1_i32 : i32
    %39 = arith.extui %38 : i1 to i32
    %c0_i32_17 = arith.constant 0 : i32
    %40 = arith.cmpi ne, %39, %c0_i32_17 : i32
    scf.if %40 {
      %c0_22 = arith.constant 0 : index
      %c8 = arith.constant 8 : index
      %50 = vector.load %arg10[%c0_22, %c8] : memref<128x32xf32, #tpu.memory_space<vmem>>, vector<128x8xf32>
      tpu.vector_store %arg10[%c0_22, %c8], %34 {strides = array<i32>} : memref<128x32xf32, #tpu.memory_space<vmem>>, vector<128x8xf32>,
    } else {
    }
    %c2_i32 = arith.constant 2 : i32
    %41 = arith.cmpi eq, %arg1, %c2_i32 : i32
    %42 = arith.extui %41 : i1 to i32
    %c0_i32_18 = arith.constant 0 : i32
    %43 = arith.cmpi ne, %42, %c0_i32_18 : i32
    scf.if %43 {
      %c0_22 = arith.constant 0 : index
      %c16 = arith.constant 16 : index
      %50 = vector.load %arg10[%c0_22, %c16] : memref<128x32xf32, #tpu.memory_space<vmem>>, vector<128x8xf32>
      tpu.vector_store %arg10[%c0_22, %c16], %34 {strides = array<i32>} : memref<128x32xf32, #tpu.memory_space<vmem>>, vector<128x8xf32>,
    } else {
    }
    %c3_i32 = arith.constant 3 : i32
    %44 = arith.cmpi eq, %arg1, %c3_i32 : i32
    %45 = arith.extui %44 : i1 to i32
    %c0_i32_19 = arith.constant 0 : i32
    %46 = arith.cmpi ne, %45, %c0_i32_19 : i32
    scf.if %46 {
      %c0_22 = arith.constant 0 : index
      %c24 = arith.constant 24 : index
      %50 = vector.load %arg10[%c0_22, %c24] : memref<128x32xf32, #tpu.memory_space<vmem>>, vector<128x8xf32>
      tpu.vector_store %arg10[%c0_22, %c24], %34 {strides = array<i32>} : memref<128x32xf32, #tpu.memory_space<vmem>>, vector<128x8xf32>,
    } else {
    }
    %c3_i32_20 = arith.constant 3 : i32
    %47 = arith.cmpi eq, %arg1, %c3_i32_20 : i32
    %48 = arith.extui %47 : i1 to i32
    %c0_i32_21 = arith.constant 0 : i32
    %49 = arith.cmpi ne, %48, %c0_i32_21 : i32
    scf.if %49 {
      %c0_22 = arith.constant 0 : index
      %c0_23 = arith.constant 0 : index
      %50 = vector.load %arg10[%c0_22, %c0_23] : memref<128x32xf32, #tpu.memory_space<vmem>>, vector<128x32xf32>
      %c0_24 = arith.constant 0 : index
      %c0_25 = arith.constant 0 : index
      %51 = vector.load %arg5[%c0_24, %c0_25] : memref<32x32xf32, #tpu.memory_space<vmem>>, vector<32x32xf32>
      %cst_26 = arith.constant dense<0.000000e+00> : vector<128x32xf32>
      %52 = tpu.matmul %50, %51, %cst_26 {dimension_numbers = #tpu.dot_dimension_numbers<[1], [0], [0], [1], [0, 0, 1, 1], [], []>} : vector<128x32xf32>, vector<32x32xf32>, vector<128x32xf32> -> vector<128x32xf32>
      %c0_27 = arith.constant 0 : index
      %c0_28 = arith.constant 0 : index
      %53 = vector.load %arg6[%c0_27, %c0_28] : memref<1x32xf32, #tpu.memory_space<vmem>>, vector<1x32xf32>
      %54 = vector.broadcast %53 : vector<1x32xf32> to vector<128x32xf32>
      %55 = arith.addf %52, %54 : vector<128x32xf32>
      %c0_29 = arith.constant 0 : index
      %c0_30 = arith.constant 0 : index
      %c0_31 = arith.constant 0 : index
      %56 = vector.load %arg7[%c0_29, %c0_30, %c0_31] : memref<1x128x32xf32, #tpu.memory_space<vmem>>, vector<1x128x32xf32>
      %57 = vector.shape_cast %56 : vector<1x128x32xf32> to vector<128x32xf32>
      %58 = vector.shape_cast %55 : vector<128x32xf32> to vector<1x128x32xf32>
      tpu.vector_store %arg7[%c0_29, %c0_30, %c0_31], %58 {strides = array<i32>} : memref<1x128x32xf32, #tpu.memory_space<vmem>>, vector<1x128x32xf32>,
    } else {
    }
    return
  }
  func.func @transform_0(%arg0: i32, %arg1: i32) -> (i32, i32, i32) {
    %c0_i32 = arith.constant 0 : i32
    %c0_i32_0 = arith.constant 0 : i32
    %c0_i32_1 = arith.constant 0 : i32
    return %arg0, %c0_i32, %c0_i32_0 : i32, i32, i32
  }
  func.func @transform_1(%arg0: i32, %arg1: i32) -> (i32, i32) {
    %c0_i32 = arith.constant 0 : i32
    %c0_i32_0 = arith.constant 0 : i32
    %c0_i32_1 = arith.constant 0 : i32
    return %c0_i32, %c0_i32_0 : i32, i32
  }
  func.func @transform_2(%arg0: i32, %arg1: i32) -> (i32, i32) {
    %c0_i32 = arith.constant 0 : i32
    %c0_i32_0 = arith.constant 0 : i32
    %c0_i32_1 = arith.constant 0 : i32
    return %c0_i32, %c0_i32_0 : i32, i32
  }
  func.func @transform_3(%arg0: i32, %arg1: i32) -> (i32, i32) {
    %c0_i32 = arith.constant 0 : i32
    %c0_i32_0 = arith.constant 0 : i32
    %c0_i32_1 = arith.constant 0 : i32
    return %c0_i32, %c0_i32_0 : i32, i32
  }
  func.func @transform_4(%arg0: i32, %arg1: i32) -> (i32, i32) {
    %c0_i32 = arith.constant 0 : i32
    %c0_i32_0 = arith.constant 0 : i32
    %c0_i32_1 = arith.constant 0 : i32
    return %c0_i32, %c0_i32_0 : i32, i32
  }
  func.func @transform_5(%arg0: i32, %arg1: i32) -> (i32, i32, i32) {
    %c0_i32 = arith.constant 0 : i32
    %c0_i32_0 = arith.constant 0 : i32
    %c0_i32_1 = arith.constant 0 : i32
    return %arg0, %c0_i32, %c0_i32_0 : i32, i32, i32
  }
  func.func @transform_6(%arg0: i32, %arg1: i32) -> (i32, i32, i32, i32) {
    %c0_i32 = arith.constant 0 : i32
    %c0_i32_0 = arith.constant 0 : i32
    %c0_i32_1 = arith.constant 0 : i32
    return %arg0, %arg1, %c0_i32, %c0_i32_0 : i32, i32, i32, i32
  }
}

</mosaic_0001>

<bundles_post_ra>
// kernel: tpu_custom_call.1
= control target key start
LH: loop header
LB: loop body
LE: loop exit
PB: predicated region body
PF: predicated region fallthrough
CT: control target
= control target key end

     0   :  { %12 = vsyncpa [#allocation5], 0  ;;  %s4582_s0 = inlined_call_operand.vmem [shape: f32[2,128,32], index: 0, kind: input, shape index: {}]   ;;  %s4583_s1 = inlined_call_operand.vmem [shape: f32[32,96], index: 1, kind: input, shape index: {}]   ;;  %s4584_s2 = inlined_call_operand.vmem [shape: f32[1,96], index: 2, kind: input, shape index: {}]   ;;  %s4585_s3 = inlined_call_operand.vmem [shape: f32[32,32], index: 3, kind: input, shape index: {}]   ;;  %s4586_s4 = inlined_call_operand.vmem [shape: f32[1,32], index: 4, kind: input, shape index: {}]   ;;  %s4587_s5 = inlined_call_operand.vmem [shape: f32[2,128,32], index: 5, kind: output, shape index: {0}]   ;;  %s4588_s6 = inlined_call_operand.hbm [shape: f32[2,4,128,128], index: 6, kind: output, shape index: {1}]  }
   0x1   :  { %14 = vsyncpa [#allocation5 + $0x1], 0  ;;  %s3249_s21 = smov 0   ;;  %s3251_s22 = smov 0  }
   0x2   :  { %s3253_s23 = smov 0   ;;  %s3255_s24 = smov 0  }
   0x3   :  { %s3257_s25 = smov 0   ;;  %s3259_s26 = smov 0  }
   0x4   :  { %s3261_s27 = smov 0   ;;  %s3263_s28 = smov 0  }
   0x5 LB: > { %s2532_s29 = sadd.s32 4294967295, %s3195_s28   ;;  %s2533_s30 = sadd.s32 4294967294, %s3195_s28   ;;  %s3195_s28 = sphi %s3263_s28, %s20_s28   ;;  %s3191_s27 = sphi %s3261_s27, %s4602_s27   ;;  %s3187_s26 = sphi %s3259_s26, %s4601_s26   ;;  %s3183_s25 = sphi %s3257_s25, %s4600_s25   ;;  %s3179_s24 = sphi %s3255_s24, %s4599_s24   ;;  %s3175_s23 = sphi %s3253_s23, %s4598_s23   ;;  %s3171_s22 = sphi %s3251_s22, %s4597_s22   ;;  %s3167_s21 = sphi %s3249_s21, %s4596_s21  }
   0x6   : > { %s29_s7 = sadd.s32 1, %s3187_s26  ;;  %s32_s8 = sadd.s32 1, %s3191_s27 }
   0x7   : > { %p30_p0 = scmp.ge.s32.totalorder %s29_s7, 4  ;;  %p187_p1 = scmp.ne.s32.totalorder %s3175_s23, %s3171_s22 }
   0x8   : > { %p188_p2 = scmp.eq.s32.totalorder %s2532_s29, 7  ;;  %p193_p5 = scmp.ne.s32.totalorder %s3171_s22, %s3167_s21 }
   0x9   : > { %s4604_s7 = smov (%p30_p0, %s29_s7), 0  ;;  %s4606_s8 = smov (!%p30_p0, %s32_s8), %s3191_s27 }
   0xa   : > { %s173_s9 = ssub.s32 %s3187_s26, %s4604_s7  ;;  %p3300_p3 = por %p188_p2, %p187_p1 }
   0xb   : > { %p34_p4 = scmp.ge.s32.totalorder %s4606_s8, 2  ;;  %p194_p6 = scmp.eq.s32.totalorder %s2533_s30, 7 }
   0xc   : > { %p2536_p7 = scmp.ge.s32.totalorder %s3195_s28, 1  ;;  %p232_p9 = scmp.lt.s32.totalorder %s3195_s28, 9 }
   0xd   : > { %s4608_s8 = smov (%p34_p4, %s4606_s8), 0  ;;  %p3309_p8 = por %p194_p6, %p193_p5 }
   0xe   : > { %4592 = sst [smem:[#allocation7_spill]] %s4608_s8  ;;  %s172_s12 = ssub.s32 %s3191_s27, %s4608_s8 }
   0xf   : > { %s177_s13 = sadd.s32 1, %s3175_s23  ;;  %s174_s14 = sor.u32 %s173_s9, %s172_s12 }
  0x10   : > { %p233_p10 = pnand %p2536_p7, %p232_p9  ;;  %p175_p11 = scmp.eq.s32.totalorder %s174_s14, 0 }
  0x11   : > { %s4589_s16 = sand.u32 (!%p233_p10), 1, %s3171_s22   ;;  %p267_p12 = scmp.lt.s32.totalorder (!%p233_p10), %s3183_s25, 1 }
  0x12   : > { %s3318_s15 = scalar_select %p175_p11, %s3175_s23, %s177_s13  }
  0x13   : > { %236 = sbr.rel (%p233_p10) target bundleno = 2198 (0x896), region = 40  ;;  %s2537_s17 = sshll.u32 (!%p233_p10), %s4589_s16, 7 }
  0x14   : > { %s3335_s14 = scalar_lea.vmem (!%p233_p10), [#allocation4], %s2537_s17  ;;  %p2542_p13 = scmp.ne.s32.totalorder (!%p233_p10), %s3179_s24, 0 }
  0x18   : > { %s268_s18 = scalar_select %p267_p12, %s3183_s25, 1 }
  0x19   : > { %280 = sbr.rel (%p2542_p13) target bundleno = 699 (0x2bb), region = 44  ;;  %s3198_s12 = smov (!%p2542_p13), 112  }
  0x1a   : > { %s2654_s19 = sshll.u32 %s268_s18, 7  ;;  %s3199_s18 = smov (!%p2542_p13), 104  }
  0x1b   : > { %s3328_s30 = scalar_lea.vmem %s4582_s0, %s2654_s19  ;;  %s3333_s13 = scalar_lea.vmem %s4587_s5, %s2654_s19 }
  0x1c   : > { %s3200_s20 = smov (!%p2542_p13), 96   ;;  %s3201_s17 = smov (!%p2542_p13), 88  }
  0x1d   : > { %s3202_s19 = smov (!%p2542_p13), 80   ;;  %s3203_s8 = smov (!%p2542_p13), 72  }
  0x1e   : > { %v300_v0 = vld [vmem:[%s4583_s1 + $0x18] sm:$0xff]  ;;  %v299_v1 = vld [vmem:[%s4583_s1 + $0x10] sm:$0xff]  ;;  %v298_v2 = vld [vmem:[%s4583_s1 + $0x8] sm:$0xff]  ;;  %vm308_vm0 = vcmask 261120   ;;  %vm502_vm1 = vcmask 64512   ;;  %s3204_s16 = smov 64  }
  0x1f   : > { %2760 = vmatprep.subr.mxu0 %v300_v0  ;;  %2936 = vmatprep.subr.mxu1 %v300_v0  ;;  %v297_v3 = vld [vmem:[%s4583_s1] sm:$0xff]  ;;  %v282_v6 = vld [vmem:[%s3328_s30 + $0x8] sm:$0xff]  ;;  %v283_v8 = vld [vmem:[%s3328_s30 + $0x10] sm:$0xff]  ;;  %s3205_s29 = smov 56   ;;  %s3206_s9 = smov 48  }
  0x20   : > { %2761 = vmatpush3.msra.mxu0 %v300_v0  ;;  %2940 = vmatpush3.msra.mxu1 %v300_v0  ;;  %v281_v4 = vld [vmem:[%s3328_s30] sm:$0xff]  ;;  %v290_v7 = vld [vmem:[%s3328_s30 + $0x48] sm:$0xff]  ;;  %v291_v9 = vld [vmem:[%s3328_s30 + $0x50] sm:$0xff] }
  0x21   : > { %2762 = vmatprep.subr.mxu0 %v299_v1  ;;  %2937 = vmatprep.subr.mxu1 %v299_v1  ;;  %v289_v5 = vld [vmem:[%s3328_s30 + $0x40] sm:$0xff]  ;;  %v284_v10 = vld [vmem:[%s3328_s30 + $0x18] sm:$0xff]  ;;  %v286_v14 = vld [vmem:[%s3328_s30 + $0x28] sm:$0xff] }
  0x22   : > { %2763 = vmatpush3.msra.mxu0 %v299_v1  ;;  %2941 = vmatpush3.msra.mxu1 %v299_v1  ;;  %v292_v11 = vld [vmem:[%s3328_s30 + $0x58] sm:$0xff]  ;;  %v285_v12 = vld [vmem:[%s3328_s30 + $0x20] sm:$0xff]  ;;  %v294_v15 = vld [vmem:[%s3328_s30 + $0x68] sm:$0xff] }
  0x23   : > { %2764 = vmatprep.subr.mxu0 %v298_v2  ;;  %2938 = vmatprep.subr.mxu1 %v298_v2  ;;  %v293_v13 = vld [vmem:[%s3328_s30 + $0x60] sm:$0xff]  ;;  %v287_v16 = vld [vmem:[%s3328_s30 + $0x30] sm:$0xff]  ;;  %v288_v18 = vld [vmem:[%s3328_s30 + $0x38] sm:$0xff] }
  0x24   : > { %2765 = vmatpush3.msra.mxu0 %v298_v2  ;;  %2942 = vmatpush3.msra.mxu1 %v298_v2  ;;  %v295_v17 = vld [vmem:[%s3328_s30 + $0x70] sm:$0xff]  ;;  %v296_v19 = vld [vmem:[%s3328_s30 + $0x78] sm:$0xff]  ;;  %v3387_v20 = vld [vmem:[%s4584_s2] ss:$0 sm:$0xff]  ;;  %s3197_s30 = smov 120  }
  0x25   : > { %2766 = vmatprep.subr.mxu0 %v297_v3  ;;  %2939 = vmatprep.subr.mxu1 %v297_v3 }
  0x26   : > { %2767 = vmatpush3.msra.mxu0 %v297_v3  ;;  %2943 = vmatpush3.msra.mxu1 %v297_v3 }
  0x27   : > { %2768 = vmatprep.mubr.msk.f32.mxu0 %vm308_vm0, %v281_v4  ;;  %2780 = vmatprep.mubr.msk.f32.mxu1 %vm308_vm0, %v289_v5 }
  0x28   : > { %2769 = vmatmul.mubr.msk.f32.vlgmr.msra.gmra.mxu0 %vm308_vm0, %v282_v6  ;;  %2781 = vmatmul.mubr.msk.f32.vlgmr.msra.gmra.mxu1 %vm308_vm0, %v290_v7 }
  0x29   : > { %2771 = vmatprep.mubr.msk.f32.mxu0 %vm308_vm0, %v283_v8  ;;  %2783 = vmatprep.mubr.msk.f32.mxu1 %vm308_vm0, %v291_v9 }
  0x2c   : > { %2772 = vmatmul.mubr.msk.f32.gmra.mxu0 %vm308_vm0, %v284_v10  ;;  %2784 = vmatmul.mubr.msk.f32.gmra.mxu1 %vm308_vm0, %v292_v11 }
  0x2d   : > { %2774 = vmatprep.mubr.msk.f32.mxu0 %vm308_vm0, %v285_v12  ;;  %2786 = vmatprep.mubr.msk.f32.mxu1 %vm308_vm0, %v293_v13 }
  0x30   : > { %2775 = vmatmul.mubr.msk.f32.gmra.mxu0 %vm308_vm0, %v286_v14  ;;  %2787 = vmatmul.mubr.msk.f32.gmra.mxu1 %vm308_vm0, %v294_v15 }
  0x31   : > { %2777 = vmatprep.mubr.msk.f32.mxu0 %vm308_vm0, %v287_v16  ;;  %2789 = vmatprep.mubr.msk.f32.mxu1 %vm308_vm0, %v295_v17 }
  0x34   : > { %2778 = vmatmul.mubr.msk.f32.gmra.mxu0 %vm308_vm0, %v288_v18  ;;  %2790 = vmatmul.mubr.msk.f32.gmra.mxu1 %vm308_vm0, %v296_v19 }
  0xe8   : > { %v2770_v21 = vpop.f32.mrf.mxu0  ;;  %v2782_v22 = vpop.f32.mrf.mxu1 }
  0xe9   : > { %v3390_v23 = vadd.f32 %v2770_v21, %v3387_v20  ;;  %v3393_v24 = vadd.f32 %v2782_v22, %v3387_v20 }
  0xea   : > { %v423_v25 = vpop.f32.mrf.mxu0  ;;  %v463_v26 = vpop.f32.mrf.mxu1 }
  0xeb   : > { %504 = vst.msk [vmem:[#allocation2 + $0x8] sm:$0xff] %vm502_vm1, %v3390_v23  ;;  %512 = vst.msk [vmem:[#allocation2 + $0x48] sm:$0xff] %vm502_vm1, %v3393_v24  ;;  %v3400_v27 = vadd.f32 %v3387_v20, %v423_v25  ;;  %v3403_v28 = vadd.f32 %v3387_v20, %v463_v26  ;;  %553 = vrot.lane.b32.xlu1 %v3393_v24, %s3197_s30  ;;  %537 = vrot.lane.b32.xlu0 %v3390_v23, %s3197_s30 }
  0xec   : > { %v2773_v29 = vpop.f32.mrf.mxu0  ;;  %v2785_v30 = vpop.f32.mrf.mxu1 }
  0xed   : > { %503 = vst.msk [vmem:[#allocation2] sm:$0xff] %vm502_vm1, %v3400_v27  ;;  %511 = vst.msk [vmem:[#allocation2 + $0x40] sm:$0xff] %vm502_vm1, %v3403_v28  ;;  %v3414_v31 = vadd.f32 %v2773_v29, %v3387_v20  ;;  %v3417_v32 = vadd.f32 %v2785_v30, %v3387_v20 }
  0xee   : > { %v433_v33 = vpop.f32.mrf.mxu0  ;;  %v473_v34 = vpop.f32.mrf.mxu1 }
  0xef   : > { %602 = vrot.lane.b32.xlu1 %v3390_v23, %s3198_s12  ;;  %535 = vrot.lane.b32.xlu0 %v3400_v27, %s3197_s30  ;;  %506 = vst.msk [vmem:[#allocation2 + $0x18] sm:$0xff] %vm502_vm1, %v3414_v31  ;;  %v3426_v35 = vadd.f32 %v3387_v20, %v433_v33  ;;  %514 = vst.msk [vmem:[#allocation2 + $0x58] sm:$0xff] %vm502_vm1, %v3417_v32  ;;  %v3431_v36 = vadd.f32 %v3387_v20, %v473_v34 }
  0xf0   : > { %v2776_v37 = vpop.f32.mrf.mxu0  ;;  %v2788_v38 = vpop.f32.mrf.mxu1 }
  0xf1   : > { %505 = vst.msk [vmem:[#allocation2 + $0x10] sm:$0xff] %vm502_vm1, %v3426_v35  ;;  %513 = vst.msk [vmem:[#allocation2 + $0x50] sm:$0xff] %vm502_vm1, %v3431_v36  ;;  %v3438_v39 = vadd.f32 %v2776_v37, %v3387_v20  ;;  %v3441_v40 = vadd.f32 %v2788_v38, %v3387_v20 }
  0xf2   : > { %v443_v41 = vpop.f32.mrf.mxu0  ;;  %v483_v42 = vpop.f32.mrf.mxu1 }
  0xf3   : > { %618 = vrot.lane.b32.xlu1 %v3393_v24, %s3198_s12  ;;  %551 = vrot.lane.b32.xlu0 %v3403_v28, %s3197_s30  ;;  %508 = vst.msk [vmem:[#allocation2 + $0x28] sm:$0xff] %vm502_vm1, %v3438_v39  ;;  %v3450_v43 = vadd.f32 %v3387_v20, %v443_v41  ;;  %516 = vst.msk [vmem:[#allocation2 + $0x68] sm:$0xff] %vm502_vm1, %v3441_v40  ;;  %v3455_v44 = vadd.f32 %v3387_v20, %v483_v42 }
  0xf4   : > { %v2779_v45 = vpop.f32.mrf.mxu0  ;;  %v2791_v49 = vpop.f32.mrf.mxu1 }
  0xf5   : > { %507 = vst.msk [vmem:[#allocation2 + $0x20] sm:$0xff] %vm502_vm1, %v3450_v43  ;;  %515 = vst.msk [vmem:[#allocation2 + $0x60] sm:$0xff] %vm502_vm1, %v3455_v44  ;;  %v3486_v46 = vadd.f32 %v2779_v45, %v3387_v20  ;;  %v3498_v50 = vadd.f32 %v2791_v49, %v3387_v20 }
  0xf6   : > { %v453_v47 = vpop.f32.mrf.mxu0  ;;  %v493_v51 = vpop.f32.mrf.mxu1 }
  0xf7   : > { %667 = vrot.lane.b32.xlu1 %v3390_v23, %s3199_s18  ;;  %600 = vrot.lane.b32.xlu0 %v3400_v27, %s3198_s12  ;;  %510 = vst.msk [vmem:[#allocation2 + $0x38] sm:$0xff] %vm502_vm1, %v3486_v46  ;;  %v3495_v48 = vadd.f32 %v3387_v20, %v453_v47  ;;  %518 = vst.msk [vmem:[#allocation2 + $0x78] sm:$0xff] %vm502_vm1, %v3498_v50  ;;  %v3509_v52 = vadd.f32 %v3387_v20, %v493_v51 }
  0xf9   : > { %509 = vst.msk [vmem:[#allocation2 + $0x30] sm:$0xff] %vm502_vm1, %v3495_v48  ;;  %517 = vst.msk [vmem:[#allocation2 + $0x70] sm:$0xff] %vm502_vm1, %v3509_v52 }
  0xfb   : > { %683 = vrot.lane.b32.xlu1 %v3393_v24, %s3199_s18  ;;  %616 = vrot.lane.b32.xlu0 %v3403_v28, %s3198_s12 }
  0xff   : > { %732 = vrot.lane.b32.xlu1 %v3390_v23, %s3200_s20  ;;  %665 = vrot.lane.b32.xlu0 %v3400_v27, %s3199_s18 }
 0x103   : > { %748 = vrot.lane.b32.xlu1 %v3393_v24, %s3200_s20  ;;  %681 = vrot.lane.b32.xlu0 %v3403_v28, %s3199_s18 }
 0x107   : > { %797 = vrot.lane.b32.xlu1 %v3390_v23, %s3201_s17  ;;  %730 = vrot.lane.b32.xlu0 %v3400_v27, %s3200_s20 }
 0x10b   : > { %813 = vrot.lane.b32.xlu1 %v3393_v24, %s3201_s17  ;;  %746 = vrot.lane.b32.xlu0 %v3403_v28, %s3200_s20 }
 0x10f   : > { %862 = vrot.lane.b32.xlu1 %v3390_v23, %s3202_s19  ;;  %795 = vrot.lane.b32.xlu0 %v3400_v27, %s3201_s17 }
 0x113   : > { %878 = vrot.lane.b32.xlu1 %v3393_v24, %s3202_s19  ;;  %811 = vrot.lane.b32.xlu0 %v3403_v28, %s3201_s17 }
 0x117   : > { %927 = vrot.lane.b32.xlu1 %v3390_v23, %s3203_s8  ;;  %860 = vrot.lane.b32.xlu0 %v3400_v27, %s3202_s19 }
 0x11b   : > { %943 = vrot.lane.b32.xlu1 %v3393_v24, %s3203_s8  ;;  %876 = vrot.lane.b32.xlu0 %v3403_v28, %s3202_s19 }
 0x11f   : > { %541 = vrot.lane.b32.xlu1 %v3414_v31, %s3197_s30  ;;  %925 = vrot.lane.b32.xlu0 %v3400_v27, %s3203_s8 }
 0x123   : > { %557 = vrot.lane.b32.xlu1 %v3417_v32, %s3197_s30  ;;  %941 = vrot.lane.b32.xlu0 %v3403_v28, %s3203_s8 }
 0x127   : > { %606 = vrot.lane.b32.xlu1 %v3414_v31, %s3198_s12  ;;  %555 = vrot.lane.b32.xlu0 %v3431_v36, %s3197_s30 }
 0x12b   : > { %622 = vrot.lane.b32.xlu1 %v3417_v32, %s3198_s12  ;;  %604 = vrot.lane.b32.xlu0 %v3426_v35, %s3198_s12 }
 0x12f   : > { %671 = vrot.lane.b32.xlu1 %v3414_v31, %s3199_s18  ;;  %620 = vrot.lane.b32.xlu0 %v3431_v36, %s3198_s12 }
 0x133   : > { %687 = vrot.lane.b32.xlu1 %v3417_v32, %s3199_s18  ;;  %669 = vrot.lane.b32.xlu0 %v3426_v35, %s3199_s18 }
 0x137   : > { %736 = vrot.lane.b32.xlu1 %v3414_v31, %s3200_s20  ;;  %685 = vrot.lane.b32.xlu0 %v3431_v36, %s3199_s18 }
 0x13b   : > { %752 = vrot.lane.b32.xlu1 %v3417_v32, %s3200_s20  ;;  %734 = vrot.lane.b32.xlu0 %v3426_v35, %s3200_s20 }
 0x13f   : > { %801 = vrot.lane.b32.xlu1 %v3414_v31, %s3201_s17  ;;  %750 = vrot.lane.b32.xlu0 %v3431_v36, %s3200_s20 }
 0x143   : > { %817 = vrot.lane.b32.xlu1 %v3417_v32, %s3201_s17  ;;  %799 = vrot.lane.b32.xlu0 %v3426_v35, %s3201_s17 }
 0x147   : > { %866 = vrot.lane.b32.xlu1 %v3414_v31, %s3202_s19  ;;  %815 = vrot.lane.b32.xlu0 %v3431_v36, %s3201_s17 }
 0x14b   : > { %882 = vrot.lane.b32.xlu1 %v3417_v32, %s3202_s19  ;;  %864 = vrot.lane.b32.xlu0 %v3426_v35, %s3202_s19 }
 0x14f   : > { %931 = vrot.lane.b32.xlu1 %v3414_v31, %s3203_s8  ;;  %880 = vrot.lane.b32.xlu0 %v3431_v36, %s3202_s19 }
 0x153   : > { %947 = vrot.lane.b32.xlu1 %v3417_v32, %s3203_s8  ;;  %929 = vrot.lane.b32.xlu0 %v3426_v35, %s3203_s8 }
 0x157   : > { %539 = vrot.lane.b32.xlu1 %v3426_v35, %s3197_s30  ;;  %945 = vrot.lane.b32.xlu0 %v3431_v36, %s3203_s8 }
 0x15b   : > { %545 = vrot.lane.b32.xlu1 %v3438_v39, %s3197_s30  ;;  %543 = vrot.lane.b32.xlu0 %v3450_v43, %s3197_s30 }
 0x15d   : > { %v554_v53 = vpop.permute.xlu1 %553  ;;  %v538_v54 = vpop.permute.xlu0 %537 }
 0x15e   : > { %593 = vst.msk [vmem:[#allocation2 + $0xc8] sm:$0xff] %vm502_vm1, %v554_v53  ;;  %585 = vst.msk [vmem:[#allocation2 + $0x88] sm:$0xff] %vm502_vm1, %v538_v54 }
 0x15f   : > { %561 = vrot.lane.b32.xlu1 %v3441_v40, %s3197_s30  ;;  %559 = vrot.lane.b32.xlu0 %v3455_v44, %s3197_s30 }
 0x161   : > { %v603_v55 = vpop.permute.xlu1 %602  ;;  %v536_v56 = vpop.permute.xlu0 %535 }
 0x162   : > { %650 = vst.msk [vmem:[#allocation2 + $0x108] sm:$0xff] %vm502_vm1, %v603_v55  ;;  %584 = vst.msk [vmem:[#allocation2 + $0x80] sm:$0xff] %vm502_vm1, %v536_v56 }
 0x163   : > { %610 = vrot.lane.b32.xlu1 %v3438_v39, %s3198_s12  ;;  %608 = vrot.lane.b32.xlu0 %v3450_v43, %s3198_s12 }
 0x165   : > { %v619_v57 = vpop.permute.xlu1 %618  ;;  %v552_v58 = vpop.permute.xlu0 %551 }
 0x166   : > { %658 = vst.msk [vmem:[#allocation2 + $0x148] sm:$0xff] %vm502_vm1, %v619_v57  ;;  %592 = vst.msk [vmem:[#allocation2 + $0xc0] sm:$0xff] %vm502_vm1, %v552_v58 }
 0x167   : > { %626 = vrot.lane.b32.xlu1 %v3441_v40, %s3198_s12  ;;  %624 = vrot.lane.b32.xlu0 %v3455_v44, %s3198_s12 }
 0x169   : > { %v668_v59 = vpop.permute.xlu1 %667  ;;  %v601_v60 = vpop.permute.xlu0 %600 }
 0x16a   : > { %715 = vst.msk [vmem:[#allocation2 + $0x188] sm:$0xff] %vm502_vm1, %v668_v59  ;;  %649 = vst.msk [vmem:[#allocation2 + $0x100] sm:$0xff] %vm502_vm1, %v601_v60 }
 0x16b   : > { %675 = vrot.lane.b32.xlu1 %v3438_v39, %s3199_s18  ;;  %673 = vrot.lane.b32.xlu0 %v3450_v43, %s3199_s18 }
 0x16d   : > { %v684_v61 = vpop.permute.xlu1 %683  ;;  %v617_v62 = vpop.permute.xlu0 %616 }
 0x16e   : > { %723 = vst.msk [vmem:[#allocation2 + $0x1c8] sm:$0xff] %vm502_vm1, %v684_v61  ;;  %657 = vst.msk [vmem:[#allocation2 + $0x140] sm:$0xff] %vm502_vm1, %v617_v62 }
 0x16f   : > { %691 = vrot.lane.b32.xlu1 %v3441_v40, %s3199_s18  ;;  %689 = vrot.lane.b32.xlu0 %v3455_v44, %s3199_s18 }
 0x171   : > { %v733_v63 = vpop.permute.xlu1 %732  ;;  %v666_v0 = vpop.permute.xlu0 %665 }
 0x172   : > { %780 = vst.msk [vmem:[#allocation2 + $0x208] sm:$0xff] %vm502_vm1, %v733_v63  ;;  %714 = vst.msk [vmem:[#allocation2 + $0x180] sm:$0xff] %vm502_vm1, %v666_v0 }
 0x173   : > { %740 = vrot.lane.b32.xlu1 %v3438_v39, %s3200_s20  ;;  %738 = vrot.lane.b32.xlu0 %v3450_v43, %s3200_s20 }
 0x175   : > { %v749_v1 = vpop.permute.xlu1 %748  ;;  %v682_v2 = vpop.permute.xlu0 %681 }
 0x176   : > { %788 = vst.msk [vmem:[#allocation2 + $0x248] sm:$0xff] %vm502_vm1, %v749_v1  ;;  %722 = vst.msk [vmem:[#allocation2 + $0x1c0] sm:$0xff] %vm502_vm1, %v682_v2 }
 0x177   : > { %756 = vrot.lane.b32.xlu1 %v3441_v40, %s3200_s20  ;;  %754 = vrot.lane.b32.xlu0 %v3455_v44, %s3200_s20 }
 0x179   : > { %v798_v3 = vpop.permute.xlu1 %797  ;;  %v731_v4 = vpop.permute.xlu0 %730 }
 0x17a   : > { %845 = vst.msk [vmem:[#allocation2 + $0x288] sm:$0xff] %vm502_vm1, %v798_v3  ;;  %779 = vst.msk [vmem:[#allocation2 + $0x200] sm:$0xff] %vm502_vm1, %v731_v4 }
 0x17b   : > { %805 = vrot.lane.b32.xlu1 %v3438_v39, %s3201_s17  ;;  %803 = vrot.lane.b32.xlu0 %v3450_v43, %s3201_s17 }
 0x17d   : > { %v814_v5 = vpop.permute.xlu1 %813  ;;  %v747_v6 = vpop.permute.xlu0 %746 }
 0x17e   : > { %853 = vst.msk [vmem:[#allocation2 + $0x2c8] sm:$0xff] %vm502_vm1, %v814_v5  ;;  %787 = vst.msk [vmem:[#allocation2 + $0x240] sm:$0xff] %vm502_vm1, %v747_v6 }
 0x17f   : > { %821 = vrot.lane.b32.xlu1 %v3441_v40, %s3201_s17  ;;  %819 = vrot.lane.b32.xlu0 %v3455_v44, %s3201_s17 }
 0x181   : > { %v863_v7 = vpop.permute.xlu1 %862  ;;  %v796_v8 = vpop.permute.xlu0 %795 }
 0x182   : > { %910 = vst.msk [vmem:[#allocation2 + $0x308] sm:$0xff] %vm502_vm1, %v863_v7  ;;  %844 = vst.msk [vmem:[#allocation2 + $0x280] sm:$0xff] %vm502_vm1, %v796_v8 }
 0x183   : > { %870 = vrot.lane.b32.xlu1 %v3438_v39, %s3202_s19  ;;  %868 = vrot.lane.b32.xlu0 %v3450_v43, %s3202_s19 }
 0x185   : > { %v879_v9 = vpop.permute.xlu1 %878  ;;  %v812_v10 = vpop.permute.xlu0 %811 }
 0x186   : > { %918 = vst.msk [vmem:[#allocation2 + $0x348] sm:$0xff] %vm502_vm1, %v879_v9  ;;  %852 = vst.msk [vmem:[#allocation2 + $0x2c0] sm:$0xff] %vm502_vm1, %v812_v10 }
 0x187   : > { %886 = vrot.lane.b32.xlu1 %v3441_v40, %s3202_s19  ;;  %884 = vrot.lane.b32.xlu0 %v3455_v44, %s3202_s19 }
 0x189   : > { %v928_v11 = vpop.permute.xlu1 %927  ;;  %v861_v12 = vpop.permute.xlu0 %860 }
 0x18a   : > { %975 = vst.msk [vmem:[#allocation2 + $0x388] sm:$0xff] %vm502_vm1, %v928_v11  ;;  %909 = vst.msk [vmem:[#allocation2 + $0x300] sm:$0xff] %vm502_vm1, %v861_v12 }
 0x18b   : > { %935 = vrot.lane.b32.xlu1 %v3438_v39, %s3203_s8  ;;  %933 = vrot.lane.b32.xlu0 %v3450_v43, %s3203_s8 }
 0x18d   : > { %v944_v13 = vpop.permute.xlu1 %943  ;;  %v877_v14 = vpop.permute.xlu0 %876 }
 0x18e   : > { %983 = vst.msk [vmem:[#allocation2 + $0x3c8] sm:$0xff] %vm502_vm1, %v944_v13  ;;  %917 = vst.msk [vmem:[#allocation2 + $0x340] sm:$0xff] %vm502_vm1, %v877_v14 }
 0x18f   : > { %951 = vrot.lane.b32.xlu1 %v3441_v40, %s3203_s8  ;;  %949 = vrot.lane.b32.xlu0 %v3455_v44, %s3203_s8 }
 0x191   : > { %v542_v15 = vpop.permute.xlu1 %541  ;;  %v926_v16 = vpop.permute.xlu0 %925 }
 0x192   : > { %587 = vst.msk [vmem:[#allocation2 + $0x98] sm:$0xff] %vm502_vm1, %v542_v15  ;;  %974 = vst.msk [vmem:[#allocation2 + $0x380] sm:$0xff] %vm502_vm1, %v926_v16 }
 0x193   : > { %549 = vrot.lane.b32.xlu1 %v3486_v46, %s3197_s30  ;;  %547 = vrot.lane.b32.xlu0 %v3495_v48, %s3197_s30 }
 0x195   : > { %v558_v17 = vpop.permute.xlu1 %557  ;;  %v942_v18 = vpop.permute.xlu0 %941 }
 0x196   : > { %595 = vst.msk [vmem:[#allocation2 + $0xd8] sm:$0xff] %vm502_vm1, %v558_v17  ;;  %982 = vst.msk [vmem:[#allocation2 + $0x3c0] sm:$0xff] %vm502_vm1, %v942_v18 }
 0x197   : > { %565 = vrot.lane.b32.xlu1 %v3498_v50, %s3197_s30  ;;  %563 = vrot.lane.b32.xlu0 %v3509_v52, %s3197_s30  ;;  %s3207_s30 = smov 40  }
 0x199   : > { %v607_v19 = vpop.permute.xlu1 %606  ;;  %v556_v20 = vpop.permute.xlu0 %555 }
 0x19a   : > { %652 = vst.msk [vmem:[#allocation2 + $0x118] sm:$0xff] %vm502_vm1, %v607_v19  ;;  %594 = vst.msk [vmem:[#allocation2 + $0xd0] sm:$0xff] %vm502_vm1, %v556_v20 }
 0x19b   : > { %614 = vrot.lane.b32.xlu1 %v3486_v46, %s3198_s12  ;;  %612 = vrot.lane.b32.xlu0 %v3495_v48, %s3198_s12 }
 0x19d   : > { %v623_v21 = vpop.permute.xlu1 %622  ;;  %v605_v22 = vpop.permute.xlu0 %604 }
 0x19e   : > { %660 = vst.msk [vmem:[#allocation2 + $0x158] sm:$0xff] %vm502_vm1, %v623_v21  ;;  %651 = vst.msk [vmem:[#allocation2 + $0x110] sm:$0xff] %vm502_vm1, %v605_v22 }
 0x19f   : > { %630 = vrot.lane.b32.xlu1 %v3498_v50, %s3198_s12  ;;  %628 = vrot.lane.b32.xlu0 %v3509_v52, %s3198_s12 }
 0x1a1   : > { %v672_v25 = vpop.permute.xlu1 %671  ;;  %v621_v26 = vpop.permute.xlu0 %620 }
 0x1a2   : > { %717 = vst.msk [vmem:[#allocation2 + $0x198] sm:$0xff] %vm502_vm1, %v672_v25  ;;  %659 = vst.msk [vmem:[#allocation2 + $0x150] sm:$0xff] %vm502_vm1, %v621_v26 }
 0x1a3   : > { %679 = vrot.lane.b32.xlu1 %v3486_v46, %s3199_s18  ;;  %677 = vrot.lane.b32.xlu0 %v3495_v48, %s3199_s18 }
 0x1a5   : > { %v688_v29 = vpop.permute.xlu1 %687  ;;  %v670_v30 = vpop.permute.xlu0 %669 }
 0x1a6   : > { %725 = vst.msk [vmem:[#allocation2 + $0x1d8] sm:$0xff] %vm502_vm1, %v688_v29  ;;  %716 = vst.msk [vmem:[#allocation2 + $0x190] sm:$0xff] %vm502_vm1, %v670_v30 }
 0x1a7   : > { %695 = vrot.lane.b32.xlu1 %v3498_v50, %s3199_s18  ;;  %693 = vrot.lane.b32.xlu0 %v3509_v52, %s3199_s18 }
 0x1a9   : > { %v737_v33 = vpop.permute.xlu1 %736  ;;  %v686_v34 = vpop.permute.xlu0 %685 }
 0x1aa   : > { %782 = vst.msk [vmem:[#allocation2 + $0x218] sm:$0xff] %vm502_vm1, %v737_v33  ;;  %724 = vst.msk [vmem:[#allocation2 + $0x1d0] sm:$0xff] %vm502_vm1, %v686_v34 }
 0x1ab   : > { %744 = vrot.lane.b32.xlu1 %v3486_v46, %s3200_s20  ;;  %742 = vrot.lane.b32.xlu0 %v3495_v48, %s3200_s20 }
 0x1ad   : > { %v753_v37 = vpop.permute.xlu1 %752  ;;  %v735_v38 = vpop.permute.xlu0 %734 }
 0x1ae   : > { %790 = vst.msk [vmem:[#allocation2 + $0x258] sm:$0xff] %vm502_vm1, %v753_v37  ;;  %781 = vst.msk [vmem:[#allocation2 + $0x210] sm:$0xff] %vm502_vm1, %v735_v38 }
 0x1af   : > { %760 = vrot.lane.b32.xlu1 %v3498_v50, %s3200_s20  ;;  %758 = vrot.lane.b32.xlu0 %v3509_v52, %s3200_s20 }
 0x1b1   : > { %v802_v41 = vpop.permute.xlu1 %801  ;;  %v751_v42 = vpop.permute.xlu0 %750 }
 0x1b2   : > { %847 = vst.msk [vmem:[#allocation2 + $0x298] sm:$0xff] %vm502_vm1, %v802_v41  ;;  %789 = vst.msk [vmem:[#allocation2 + $0x250] sm:$0xff] %vm502_vm1, %v751_v42 }
 0x1b3   : > { %809 = vrot.lane.b32.xlu1 %v3486_v46, %s3201_s17  ;;  %807 = vrot.lane.b32.xlu0 %v3495_v48, %s3201_s17 }
 0x1b5   : > { %v818_v45 = vpop.permute.xlu1 %817  ;;  %v800_v47 = vpop.permute.xlu0 %799 }
 0x1b6   : > { %855 = vst.msk [vmem:[#allocation2 + $0x2d8] sm:$0xff] %vm502_vm1, %v818_v45  ;;  %846 = vst.msk [vmem:[#allocation2 + $0x290] sm:$0xff] %vm502_vm1, %v800_v47 }
 0x1b7   : > { %825 = vrot.lane.b32.xlu1 %v3498_v50, %s3201_s17  ;;  %823 = vrot.lane.b32.xlu0 %v3509_v52, %s3201_s17 }
 0x1b9   : > { %v867_v49 = vpop.permute.xlu1 %866  ;;  %v816_v51 = vpop.permute.xlu0 %815 }
 0x1ba   : > { %912 = vst.msk [vmem:[#allocation2 + $0x318] sm:$0xff] %vm502_vm1, %v867_v49  ;;  %854 = vst.msk [vmem:[#allocation2 + $0x2d0] sm:$0xff] %vm502_vm1, %v816_v51 }
 0x1bb   : > { %874 = vrot.lane.b32.xlu1 %v3486_v46, %s3202_s19  ;;  %872 = vrot.lane.b32.xlu0 %v3495_v48, %s3202_s19 }
 0x1bd   : > { %v883_v53 = vpop.permute.xlu1 %882  ;;  %v865_v54 = vpop.permute.xlu0 %864 }
 0x1be   : > { %920 = vst.msk [vmem:[#allocation2 + $0x358] sm:$0xff] %vm502_vm1, %v883_v53  ;;  %911 = vst.msk [vmem:[#allocation2 + $0x310] sm:$0xff] %vm502_vm1, %v865_v54 }
 0x1bf   : > { %890 = vrot.lane.b32.xlu1 %v3498_v50, %s3202_s19  ;;  %888 = vrot.lane.b32.xlu0 %v3509_v52, %s3202_s19 }
 0x1c1   : > { %v932_v55 = vpop.permute.xlu1 %931  ;;  %v881_v56 = vpop.permute.xlu0 %880 }
 0x1c2   : > { %977 = vst.msk [vmem:[#allocation2 + $0x398] sm:$0xff] %vm502_vm1, %v932_v55  ;;  %919 = vst.msk [vmem:[#allocation2 + $0x350] sm:$0xff] %vm502_vm1, %v881_v56 }
 0x1c3   : > { %939 = vrot.lane.b32.xlu1 %v3486_v46, %s3203_s8  ;;  %937 = vrot.lane.b32.xlu0 %v3495_v48, %s3203_s8 }
 0x1c5   : > { %v948_v57 = vpop.permute.xlu1 %947  ;;  %v930_v58 = vpop.permute.xlu0 %929 }
 0x1c6   : > { %985 = vst.msk [vmem:[#allocation2 + $0x3d8] sm:$0xff] %vm502_vm1, %v948_v57  ;;  %976 = vst.msk [vmem:[#allocation2 + $0x390] sm:$0xff] %vm502_vm1, %v930_v58 }
 0x1c7   : > { %955 = vrot.lane.b32.xlu1 %v3498_v50, %s3203_s8  ;;  %953 = vrot.lane.b32.xlu0 %v3509_v52, %s3203_s8 }
 0x1c9   : > { %v540_v59 = vpop.permute.xlu1 %539  ;;  %v946_v60 = vpop.permute.xlu0 %945 }
 0x1ca   : > { %586 = vst.msk [vmem:[#allocation2 + $0x90] sm:$0xff] %vm502_vm1, %v540_v59  ;;  %984 = vst.msk [vmem:[#allocation2 + $0x3d0] sm:$0xff] %vm502_vm1, %v946_v60 }
 0x1cb   : > { %992 = vrot.lane.b32.xlu1 %v3390_v23, %s3204_s16  ;;  %990 = vrot.lane.b32.xlu0 %v3400_v27, %s3204_s16 }
 0x1cd   : > { %v546_v61 = vpop.permute.xlu1 %545  ;;  %v544_v62 = vpop.permute.xlu0 %543 }
 0x1ce   : > { %589 = vst.msk [vmem:[#allocation2 + $0xa8] sm:$0xff] %vm502_vm1, %v546_v61  ;;  %588 = vst.msk [vmem:[#allocation2 + $0xa0] sm:$0xff] %vm502_vm1, %v544_v62 }
 0x1cf   : > { %996 = vrot.lane.b32.xlu1 %v3414_v31, %s3204_s16  ;;  %994 = vrot.lane.b32.xlu0 %v3426_v35, %s3204_s16 }
 0x1d1   : > { %v562_v63 = vpop.permute.xlu1 %561  ;;  %v560_v0 = vpop.permute.xlu0 %559 }
 0x1d2   : > { %597 = vst.msk [vmem:[#allocation2 + $0xe8] sm:$0xff] %vm502_vm1, %v562_v63  ;;  %596 = vst.msk [vmem:[#allocation2 + $0xe0] sm:$0xff] %vm502_vm1, %v560_v0 }
 0x1d3   : > { %1000 = vrot.lane.b32.xlu1 %v3438_v39, %s3204_s16  ;;  %998 = vrot.lane.b32.xlu0 %v3450_v43, %s3204_s16 }
 0x1d5   : > { %v611_v1 = vpop.permute.xlu1 %610  ;;  %v609_v2 = vpop.permute.xlu0 %608 }
 0x1d6   : > { %654 = vst.msk [vmem:[#allocation2 + $0x128] sm:$0xff] %vm502_vm1, %v611_v1  ;;  %653 = vst.msk [vmem:[#allocation2 + $0x120] sm:$0xff] %vm502_vm1, %v609_v2 }
 0x1d7   : > { %1004 = vrot.lane.b32.xlu1 %v3486_v46, %s3204_s16  ;;  %1002 = vrot.lane.b32.xlu0 %v3495_v48, %s3204_s16 }
 0x1d9   : > { %v627_v3 = vpop.permute.xlu1 %626  ;;  %v625_v4 = vpop.permute.xlu0 %624 }
 0x1da   : > { %662 = vst.msk [vmem:[#allocation2 + $0x168] sm:$0xff] %vm502_vm1, %v627_v3  ;;  %661 = vst.msk [vmem:[#allocation2 + $0x160] sm:$0xff] %vm502_vm1, %v625_v4 }
 0x1db   : > { %1008 = vrot.lane.b32.xlu1 %v3393_v24, %s3204_s16  ;;  %1006 = vrot.lane.b32.xlu0 %v3403_v28, %s3204_s16 }
 0x1dd   : > { %v676_v5 = vpop.permute.xlu1 %675  ;;  %v674_v6 = vpop.permute.xlu0 %673 }
 0x1de   : > { %719 = vst.msk [vmem:[#allocation2 + $0x1a8] sm:$0xff] %vm502_vm1, %v676_v5  ;;  %718 = vst.msk [vmem:[#allocation2 + $0x1a0] sm:$0xff] %vm502_vm1, %v674_v6 }
 0x1df   : > { %1012 = vrot.lane.b32.xlu1 %v3417_v32, %s3204_s16  ;;  %1010 = vrot.lane.b32.xlu0 %v3431_v36, %s3204_s16 }
 0x1e1   : > { %v692_v7 = vpop.permute.xlu1 %691  ;;  %v690_v8 = vpop.permute.xlu0 %689 }
 0x1e2   : > { %727 = vst.msk [vmem:[#allocation2 + $0x1e8] sm:$0xff] %vm502_vm1, %v692_v7  ;;  %726 = vst.msk [vmem:[#allocation2 + $0x1e0] sm:$0xff] %vm502_vm1, %v690_v8 }
 0x1e3   : > { %1016 = vrot.lane.b32.xlu1 %v3441_v40, %s3204_s16  ;;  %1014 = vrot.lane.b32.xlu0 %v3455_v44, %s3204_s16 }
 0x1e5   : > { %v741_v9 = vpop.permute.xlu1 %740  ;;  %v739_v10 = vpop.permute.xlu0 %738 }
 0x1e6   : > { %784 = vst.msk [vmem:[#allocation2 + $0x228] sm:$0xff] %vm502_vm1, %v741_v9  ;;  %783 = vst.msk [vmem:[#allocation2 + $0x220] sm:$0xff] %vm502_vm1, %v739_v10 }
 0x1e7   : > { %1020 = vrot.lane.b32.xlu1 %v3498_v50, %s3204_s16  ;;  %1018 = vrot.lane.b32.xlu0 %v3509_v52, %s3204_s16 }
 0x1e9   : > { %v757_v11 = vpop.permute.xlu1 %756  ;;  %v755_v12 = vpop.permute.xlu0 %754 }
 0x1ea   : > { %792 = vst.msk [vmem:[#allocation2 + $0x268] sm:$0xff] %vm502_vm1, %v757_v11  ;;  %791 = vst.msk [vmem:[#allocation2 + $0x260] sm:$0xff] %vm502_vm1, %v755_v12 }
 0x1eb   : > { %1057 = vrot.lane.b32.xlu1 %v3390_v23, %s3205_s29  ;;  %1055 = vrot.lane.b32.xlu0 %v3400_v27, %s3205_s29 }
 0x1ed   : > { %v806_v13 = vpop.permute.xlu1 %805  ;;  %v804_v14 = vpop.permute.xlu0 %803 }
 0x1ee   : > { %849 = vst.msk [vmem:[#allocation2 + $0x2a8] sm:$0xff] %vm502_vm1, %v806_v13  ;;  %848 = vst.msk [vmem:[#allocation2 + $0x2a0] sm:$0xff] %vm502_vm1, %v804_v14 }
 0x1ef   : > { %1061 = vrot.lane.b32.xlu1 %v3414_v31, %s3205_s29  ;;  %1059 = vrot.lane.b32.xlu0 %v3426_v35, %s3205_s29 }
 0x1f1   : > { %v822_v15 = vpop.permute.xlu1 %821  ;;  %v820_v16 = vpop.permute.xlu0 %819 }
 0x1f2   : > { %857 = vst.msk [vmem:[#allocation2 + $0x2e8] sm:$0xff] %vm502_vm1, %v822_v15  ;;  %856 = vst.msk [vmem:[#allocation2 + $0x2e0] sm:$0xff] %vm502_vm1, %v820_v16 }
 0x1f3   : > { %1065 = vrot.lane.b32.xlu1 %v3438_v39, %s3205_s29  ;;  %1063 = vrot.lane.b32.xlu0 %v3450_v43, %s3205_s29 }
 0x1f5   : > { %v871_v17 = vpop.permute.xlu1 %870  ;;  %v869_v18 = vpop.permute.xlu0 %868 }
 0x1f6   : > { %914 = vst.msk [vmem:[#allocation2 + $0x328] sm:$0xff] %vm502_vm1, %v871_v17  ;;  %913 = vst.msk [vmem:[#allocation2 + $0x320] sm:$0xff] %vm502_vm1, %v869_v18 }
 0x1f7   : > { %1069 = vrot.lane.b32.xlu1 %v3486_v46, %s3205_s29  ;;  %1067 = vrot.lane.b32.xlu0 %v3495_v48, %s3205_s29 }
 0x1f9   : > { %v887_v19 = vpop.permute.xlu1 %886  ;;  %v885_v20 = vpop.permute.xlu0 %884 }
 0x1fa   : > { %922 = vst.msk [vmem:[#allocation2 + $0x368] sm:$0xff] %vm502_vm1, %v887_v19  ;;  %921 = vst.msk [vmem:[#allocation2 + $0x360] sm:$0xff] %vm502_vm1, %v885_v20 }
 0x1fb   : > { %1073 = vrot.lane.b32.xlu1 %v3393_v24, %s3205_s29  ;;  %1071 = vrot.lane.b32.xlu0 %v3403_v28, %s3205_s29 }
 0x1fd   : > { %v936_v21 = vpop.permute.xlu1 %935  ;;  %v934_v22 = vpop.permute.xlu0 %933 }
 0x1fe   : > { %979 = vst.msk [vmem:[#allocation2 + $0x3a8] sm:$0xff] %vm502_vm1, %v936_v21  ;;  %978 = vst.msk [vmem:[#allocation2 + $0x3a0] sm:$0xff] %vm502_vm1, %v934_v22 }
 0x1ff   : > { %1077 = vrot.lane.b32.xlu1 %v3417_v32, %s3205_s29  ;;  %1075 = vrot.lane.b32.xlu0 %v3431_v36, %s3205_s29 }
 0x201   : > { %v952_v25 = vpop.permute.xlu1 %951  ;;  %v950_v26 = vpop.permute.xlu0 %949 }
 0x202   : > { %987 = vst.msk [vmem:[#allocation2 + $0x3e8] sm:$0xff] %vm502_vm1, %v952_v25  ;;  %986 = vst.msk [vmem:[#allocation2 + $0x3e0] sm:$0xff] %vm502_vm1, %v950_v26 }
 0x203   : > { %1081 = vrot.lane.b32.xlu1 %v3441_v40, %s3205_s29  ;;  %1079 = vrot.lane.b32.xlu0 %v3455_v44, %s3205_s29 }
 0x205   : > { %v550_v29 = vpop.permute.xlu1 %549  ;;  %v548_v30 = vpop.permute.xlu0 %547 }
 0x206   : > { %591 = vst.msk [vmem:[#allocation2 + $0xb8] sm:$0xff] %vm502_vm1, %v550_v29  ;;  %590 = vst.msk [vmem:[#allocation2 + $0xb0] sm:$0xff] %vm502_vm1, %v548_v30 }
 0x207   : > { %1085 = vrot.lane.b32.xlu1 %v3498_v50, %s3205_s29  ;;  %1083 = vrot.lane.b32.xlu0 %v3509_v52, %s3205_s29 }
 0x209   : > { %v566_v33 = vpop.permute.xlu1 %565  ;;  %v564_v34 = vpop.permute.xlu0 %563 }
 0x20a   : > { %599 = vst.msk [vmem:[#allocation2 + $0xf8] sm:$0xff] %vm502_vm1, %v566_v33  ;;  %598 = vst.msk [vmem:[#allocation2 + $0xf0] sm:$0xff] %vm502_vm1, %v564_v34 }
 0x20b   : > { %1122 = vrot.lane.b32.xlu1 %v3390_v23, %s3206_s9  ;;  %1120 = vrot.lane.b32.xlu0 %v3400_v27, %s3206_s9 }
 0x20d   : > { %v615_v37 = vpop.permute.xlu1 %614  ;;  %v613_v38 = vpop.permute.xlu0 %612 }
 0x20e   : > { %656 = vst.msk [vmem:[#allocation2 + $0x138] sm:$0xff] %vm502_vm1, %v615_v37  ;;  %655 = vst.msk [vmem:[#allocation2 + $0x130] sm:$0xff] %vm502_vm1, %v613_v38 }
 0x20f   : > { %1126 = vrot.lane.b32.xlu1 %v3414_v31, %s3206_s9  ;;  %1124 = vrot.lane.b32.xlu0 %v3426_v35, %s3206_s9 }
 0x211   : > { %v631_v41 = vpop.permute.xlu1 %630  ;;  %v629_v42 = vpop.permute.xlu0 %628 }
 0x212   : > { %664 = vst.msk [vmem:[#allocation2 + $0x178] sm:$0xff] %vm502_vm1, %v631_v41  ;;  %663 = vst.msk [vmem:[#allocation2 + $0x170] sm:$0xff] %vm502_vm1, %v629_v42 }
 0x213   : > { %1130 = vrot.lane.b32.xlu1 %v3438_v39, %s3206_s9  ;;  %1128 = vrot.lane.b32.xlu0 %v3450_v43, %s3206_s9 }
 0x215   : > { %v680_v45 = vpop.permute.xlu1 %679  ;;  %v678_v47 = vpop.permute.xlu0 %677 }
 0x216   : > { %721 = vst.msk [vmem:[#allocation2 + $0x1b8] sm:$0xff] %vm502_vm1, %v680_v45  ;;  %720 = vst.msk [vmem:[#allocation2 + $0x1b0] sm:$0xff] %vm502_vm1, %v678_v47 }
 0x217   : > { %1134 = vrot.lane.b32.xlu1 %v3486_v46, %s3206_s9  ;;  %1132 = vrot.lane.b32.xlu0 %v3495_v48, %s3206_s9 }
 0x219   : > { %v696_v49 = vpop.permute.xlu1 %695  ;;  %v694_v51 = vpop.permute.xlu0 %693 }
 0x21a   : > { %729 = vst.msk [vmem:[#allocation2 + $0x1f8] sm:$0xff] %vm502_vm1, %v696_v49  ;;  %728 = vst.msk [vmem:[#allocation2 + $0x1f0] sm:$0xff] %vm502_vm1, %v694_v51 }
 0x21b   : > { %1138 = vrot.lane.b32.xlu1 %v3393_v24, %s3206_s9  ;;  %1136 = vrot.lane.b32.xlu0 %v3403_v28, %s3206_s9 }
 0x21d   : > { %v745_v53 = vpop.permute.xlu1 %744  ;;  %v743_v54 = vpop.permute.xlu0 %742 }
 0x21e   : > { %786 = vst.msk [vmem:[#allocation2 + $0x238] sm:$0xff] %vm502_vm1, %v745_v53  ;;  %785 = vst.msk [vmem:[#allocation2 + $0x230] sm:$0xff] %vm502_vm1, %v743_v54 }
 0x21f   : > { %1142 = vrot.lane.b32.xlu1 %v3417_v32, %s3206_s9  ;;  %1140 = vrot.lane.b32.xlu0 %v3431_v36, %s3206_s9 }
 0x221   : > { %v761_v55 = vpop.permute.xlu1 %760  ;;  %v759_v56 = vpop.permute.xlu0 %758 }
 0x222   : > { %794 = vst.msk [vmem:[#allocation2 + $0x278] sm:$0xff] %vm502_vm1, %v761_v55  ;;  %793 = vst.msk [vmem:[#allocation2 + $0x270] sm:$0xff] %vm502_vm1, %v759_v56 }
 0x223   : > { %1146 = vrot.lane.b32.xlu1 %v3441_v40, %s3206_s9  ;;  %1144 = vrot.lane.b32.xlu0 %v3455_v44, %s3206_s9 }
 0x225   : > { %v810_v57 = vpop.permute.xlu1 %809  ;;  %v808_v58 = vpop.permute.xlu0 %807 }
 0x226   : > { %851 = vst.msk [vmem:[#allocation2 + $0x2b8] sm:$0xff] %vm502_vm1, %v810_v57  ;;  %850 = vst.msk [vmem:[#allocation2 + $0x2b0] sm:$0xff] %vm502_vm1, %v808_v58 }
 0x227   : > { %1150 = vrot.lane.b32.xlu1 %v3498_v50, %s3206_s9  ;;  %1148 = vrot.lane.b32.xlu0 %v3509_v52, %s3206_s9 }
 0x229   : > { %v826_v59 = vpop.permute.xlu1 %825  ;;  %v824_v60 = vpop.permute.xlu0 %823 }
 0x22a   : > { %859 = vst.msk [vmem:[#allocation2 + $0x2f8] sm:$0xff] %vm502_vm1, %v826_v59  ;;  %858 = vst.msk [vmem:[#allocation2 + $0x2f0] sm:$0xff] %vm502_vm1, %v824_v60 }
 0x22b   : > { %1187 = vrot.lane.b32.xlu1 %v3390_v23, %s3207_s30  ;;  %1185 = vrot.lane.b32.xlu0 %v3400_v27, %s3207_s30 }
 0x22d   : > { %v875_v61 = vpop.permute.xlu1 %874  ;;  %v873_v62 = vpop.permute.xlu0 %872 }
 0x22e   : > { %916 = vst.msk [vmem:[#allocation2 + $0x338] sm:$0xff] %vm502_vm1, %v875_v61  ;;  %915 = vst.msk [vmem:[#allocation2 + $0x330] sm:$0xff] %vm502_vm1, %v873_v62 }
 0x22f   : > { %1191 = vrot.lane.b32.xlu1 %v3414_v31, %s3207_s30  ;;  %1189 = vrot.lane.b32.xlu0 %v3426_v35, %s3207_s30 }
 0x231   : > { %v891_v63 = vpop.permute.xlu1 %890  ;;  %v889_v0 = vpop.permute.xlu0 %888 }
 0x232   : > { %924 = vst.msk [vmem:[#allocation2 + $0x378] sm:$0xff] %vm502_vm1, %v891_v63  ;;  %923 = vst.msk [vmem:[#allocation2 + $0x370] sm:$0xff] %vm502_vm1, %v889_v0 }
 0x233   : > { %1195 = vrot.lane.b32.xlu1 %v3438_v39, %s3207_s30  ;;  %1193 = vrot.lane.b32.xlu0 %v3450_v43, %s3207_s30 }
 0x235   : > { %v940_v23 = vpop.permute.xlu1 %939  ;;  %v938_v27 = vpop.permute.xlu0 %937 }
 0x236   : > { %981 = vst.msk [vmem:[#allocation2 + $0x3b8] sm:$0xff] %vm502_vm1, %v940_v23  ;;  %980 = vst.msk [vmem:[#allocation2 + $0x3b0] sm:$0xff] %vm502_vm1, %v938_v27 }
 0x237   : > { %1199 = vrot.lane.b32.xlu1 %v3486_v46, %s3207_s30  ;;  %1197 = vrot.lane.b32.xlu0 %v3495_v48, %s3207_s30 }
 0x239   : > { %v956_v31 = vpop.permute.xlu1 %955  ;;  %v954_v35 = vpop.permute.xlu0 %953 }
 0x23a   : > { %989 = vst.msk [vmem:[#allocation2 + $0x3f8] sm:$0xff] %vm502_vm1, %v956_v31  ;;  %988 = vst.msk [vmem:[#allocation2 + $0x3f0] sm:$0xff] %vm502_vm1, %v954_v35 }
 0x23b   : > { %1203 = vrot.lane.b32.xlu1 %v3393_v24, %s3207_s30  ;;  %1201 = vrot.lane.b32.xlu0 %v3403_v28, %s3207_s30 }
 0x23d   : > { %v993_v39 = vpop.permute.xlu1 %992  ;;  %v991_v43 = vpop.permute.xlu0 %990 }
 0x23e   : > { %1040 = vst.msk [vmem:[#allocation2 + $0x408] sm:$0xff] %vm502_vm1, %v993_v39  ;;  %1039 = vst.msk [vmem:[#allocation2 + $0x400] sm:$0xff] %vm502_vm1, %v991_v43 }
 0x23f   : > { %1207 = vrot.lane.b32.xlu1 %v3417_v32, %s3207_s30  ;;  %1205 = vrot.lane.b32.xlu0 %v3431_v36, %s3207_s30 }
 0x241   : > { %v997_v46 = vpop.permute.xlu1 %996  ;;  %v995_v48 = vpop.permute.xlu0 %994 }
 0x242   : > { %1042 = vst.msk [vmem:[#allocation2 + $0x418] sm:$0xff] %vm502_vm1, %v997_v46  ;;  %1041 = vst.msk [vmem:[#allocation2 + $0x410] sm:$0xff] %vm502_vm1, %v995_v48 }
 0x243   : > { %1211 = vrot.lane.b32.xlu1 %v3441_v40, %s3207_s30  ;;  %1209 = vrot.lane.b32.xlu0 %v3455_v44, %s3207_s30 }
 0x245   : > { %v1001_v24 = vpop.permute.xlu1 %1000  ;;  %v999_v28 = vpop.permute.xlu0 %998 }
 0x246   : > { %1044 = vst.msk [vmem:[#allocation2 + $0x428] sm:$0xff] %vm502_vm1, %v1001_v24  ;;  %1043 = vst.msk [vmem:[#allocation2 + $0x420] sm:$0xff] %vm502_vm1, %v999_v28 }
 0x247   : > { %1215 = vrot.lane.b32.xlu1 %v3498_v50, %s3207_s30  ;;  %1213 = vrot.lane.b32.xlu0 %v3509_v52, %s3207_s30 }
 0x249   : > { %v1005_v32 = vpop.permute.xlu1 %1004  ;;  %v1003_v36 = vpop.permute.xlu0 %1002 }
 0x24a   : > { %1046 = vst.msk [vmem:[#allocation2 + $0x438] sm:$0xff] %vm502_vm1, %v1005_v32  ;;  %1045 = vst.msk [vmem:[#allocation2 + $0x430] sm:$0xff] %vm502_vm1, %v1003_v36 }
 0x24d   : > { %v1009_v40 = vpop.permute.xlu1 %1008  ;;  %v1007_v44 = vpop.permute.xlu0 %1006 }
 0x24e   : > { %1048 = vst.msk [vmem:[#allocation2 + $0x448] sm:$0xff] %vm502_vm1, %v1009_v40  ;;  %1047 = vst.msk [vmem:[#allocation2 + $0x440] sm:$0xff] %vm502_vm1, %v1007_v44 }
 0x251   : > { %v1013_v1 = vpop.permute.xlu1 %1012  ;;  %v1011_v2 = vpop.permute.xlu0 %1010 }
 0x252   : > { %1050 = vst.msk [vmem:[#allocation2 + $0x458] sm:$0xff] %vm502_vm1, %v1013_v1  ;;  %1049 = vst.msk [vmem:[#allocation2 + $0x450] sm:$0xff] %vm502_vm1, %v1011_v2 }
 0x255   : > { %v1017_v50 = vpop.permute.xlu1 %1016  ;;  %v1015_v52 = vpop.permute.xlu0 %1014 }
 0x256   : > { %1052 = vst.msk [vmem:[#allocation2 + $0x468] sm:$0xff] %vm502_vm1, %v1017_v50  ;;  %1051 = vst.msk [vmem:[#allocation2 + $0x460] sm:$0xff] %vm502_vm1, %v1015_v52 }
 0x259   : > { %v1021_v3 = vpop.permute.xlu1 %1020  ;;  %v1019_v4 = vpop.permute.xlu0 %1018 }
 0x25a   : > { %1054 = vst.msk [vmem:[#allocation2 + $0x478] sm:$0xff] %vm502_vm1, %v1021_v3  ;;  %1053 = vst.msk [vmem:[#allocation2 + $0x470] sm:$0xff] %vm502_vm1, %v1019_v4 }
 0x25d   : > { %v1058_v5 = vpop.permute.xlu1 %1057  ;;  %v1056_v6 = vpop.permute.xlu0 %1055 }
 0x25e   : > { %1105 = vst.msk [vmem:[#allocation2 + $0x488] sm:$0xff] %vm502_vm1, %v1058_v5  ;;  %1104 = vst.msk [vmem:[#allocation2 + $0x480] sm:$0xff] %vm502_vm1, %v1056_v6 }
 0x261   : > { %v1062_v7 = vpop.permute.xlu1 %1061  ;;  %v1060_v8 = vpop.permute.xlu0 %1059 }
 0x262   : > { %1107 = vst.msk [vmem:[#allocation2 + $0x498] sm:$0xff] %vm502_vm1, %v1062_v7  ;;  %1106 = vst.msk [vmem:[#allocation2 + $0x490] sm:$0xff] %vm502_vm1, %v1060_v8 }
 0x265   : > { %v1066_v9 = vpop.permute.xlu1 %1065  ;;  %v1064_v10 = vpop.permute.xlu0 %1063 }
 0x266   : > { %1109 = vst.msk [vmem:[#allocation2 + $0x4a8] sm:$0xff] %vm502_vm1, %v1066_v9  ;;  %1108 = vst.msk [vmem:[#allocation2 + $0x4a0] sm:$0xff] %vm502_vm1, %v1064_v10 }
 0x269   : > { %v1070_v11 = vpop.permute.xlu1 %1069  ;;  %v1068_v12 = vpop.permute.xlu0 %1067 }
 0x26a   : > { %1111 = vst.msk [vmem:[#allocation2 + $0x4b8] sm:$0xff] %vm502_vm1, %v1070_v11  ;;  %1110 = vst.msk [vmem:[#allocation2 + $0x4b0] sm:$0xff] %vm502_vm1, %v1068_v12 }
 0x26d   : > { %v1074_v13 = vpop.permute.xlu1 %1073  ;;  %v1072_v14 = vpop.permute.xlu0 %1071 }
 0x26e   : > { %1113 = vst.msk [vmem:[#allocation2 + $0x4c8] sm:$0xff] %vm502_vm1, %v1074_v13  ;;  %1112 = vst.msk [vmem:[#allocation2 + $0x4c0] sm:$0xff] %vm502_vm1, %v1072_v14 }
 0x271   : > { %v1078_v15 = vpop.permute.xlu1 %1077  ;;  %v1076_v16 = vpop.permute.xlu0 %1075 }
 0x272   : > { %1115 = vst.msk [vmem:[#allocation2 + $0x4d8] sm:$0xff] %vm502_vm1, %v1078_v15  ;;  %1114 = vst.msk [vmem:[#allocation2 + $0x4d0] sm:$0xff] %vm502_vm1, %v1076_v16 }
 0x275   : > { %v1082_v17 = vpop.permute.xlu1 %1081  ;;  %v1080_v18 = vpop.permute.xlu0 %1079 }
 0x276   : > { %1117 = vst.msk [vmem:[#allocation2 + $0x4e8] sm:$0xff] %vm502_vm1, %v1082_v17  ;;  %1116 = vst.msk [vmem:[#allocation2 + $0x4e0] sm:$0xff] %vm502_vm1, %v1080_v18 }
 0x279   : > { %v1086_v19 = vpop.permute.xlu1 %1085  ;;  %v1084_v20 = vpop.permute.xlu0 %1083 }
 0x27a   : > { %1119 = vst.msk [vmem:[#allocation2 + $0x4f8] sm:$0xff] %vm502_vm1, %v1086_v19  ;;  %1118 = vst.msk [vmem:[#allocation2 + $0x4f0] sm:$0xff] %vm502_vm1, %v1084_v20 }
 0x27d   : > { %v1123_v21 = vpop.permute.xlu1 %1122  ;;  %v1121_v22 = vpop.permute.xlu0 %1120 }
 0x27e   : > { %1170 = vst.msk [vmem:[#allocation2 + $0x508] sm:$0xff] %vm502_vm1, %v1123_v21  ;;  %1169 = vst.msk [vmem:[#allocation2 + $0x500] sm:$0xff] %vm502_vm1, %v1121_v22 }
 0x281   : > { %v1127_v25 = vpop.permute.xlu1 %1126  ;;  %v1125_v26 = vpop.permute.xlu0 %1124 }
 0x282   : > { %1172 = vst.msk [vmem:[#allocation2 + $0x518] sm:$0xff] %vm502_vm1, %v1127_v25  ;;  %1171 = vst.msk [vmem:[#allocation2 + $0x510] sm:$0xff] %vm502_vm1, %v1125_v26 }
 0x285   : > { %v1131_v29 = vpop.permute.xlu1 %1130  ;;  %v1129_v30 = vpop.permute.xlu0 %1128 }
 0x286   : > { %1174 = vst.msk [vmem:[#allocation2 + $0x528] sm:$0xff] %vm502_vm1, %v1131_v29  ;;  %1173 = vst.msk [vmem:[#allocation2 + $0x520] sm:$0xff] %vm502_vm1, %v1129_v30 }
 0x289   : > { %v1135_v33 = vpop.permute.xlu1 %1134  ;;  %v1133_v34 = vpop.permute.xlu0 %1132 }
 0x28a   : > { %1176 = vst.msk [vmem:[#allocation2 + $0x538] sm:$0xff] %vm502_vm1, %v1135_v33  ;;  %1175 = vst.msk [vmem:[#allocation2 + $0x530] sm:$0xff] %vm502_vm1, %v1133_v34 }
 0x28d   : > { %v1139_v37 = vpop.permute.xlu1 %1138  ;;  %v1137_v38 = vpop.permute.xlu0 %1136 }
 0x28e   : > { %1178 = vst.msk [vmem:[#allocation2 + $0x548] sm:$0xff] %vm502_vm1, %v1139_v37  ;;  %1177 = vst.msk [vmem:[#allocation2 + $0x540] sm:$0xff] %vm502_vm1, %v1137_v38 }
 0x291   : > { %v1143_v41 = vpop.permute.xlu1 %1142  ;;  %v1141_v42 = vpop.permute.xlu0 %1140 }
 0x292   : > { %1180 = vst.msk [vmem:[#allocation2 + $0x558] sm:$0xff] %vm502_vm1, %v1143_v41  ;;  %1179 = vst.msk [vmem:[#allocation2 + $0x550] sm:$0xff] %vm502_vm1, %v1141_v42 }
 0x295   : > { %v1147_v45 = vpop.permute.xlu1 %1146  ;;  %v1145_v47 = vpop.permute.xlu0 %1144 }
 0x296   : > { %1182 = vst.msk [vmem:[#allocation2 + $0x568] sm:$0xff] %vm502_vm1, %v1147_v45  ;;  %1181 = vst.msk [vmem:[#allocation2 + $0x560] sm:$0xff] %vm502_vm1, %v1145_v47 }
 0x299   : > { %v1151_v49 = vpop.permute.xlu1 %1150  ;;  %v1149_v51 = vpop.permute.xlu0 %1148 }
 0x29a   : > { %1184 = vst.msk [vmem:[#allocation2 + $0x578] sm:$0xff] %vm502_vm1, %v1151_v49  ;;  %1183 = vst.msk [vmem:[#allocation2 + $0x570] sm:$0xff] %vm502_vm1, %v1149_v51 }
 0x29d   : > { %v1188_v53 = vpop.permute.xlu1 %1187  ;;  %v1186_v54 = vpop.permute.xlu0 %1185 }
 0x29e   : > { %1235 = vst.msk [vmem:[#allocation2 + $0x588] sm:$0xff] %vm502_vm1, %v1188_v53  ;;  %1234 = vst.msk [vmem:[#allocation2 + $0x580] sm:$0xff] %vm502_vm1, %v1186_v54 }
 0x2a1   : > { %v1192_v55 = vpop.permute.xlu1 %1191  ;;  %v1190_v56 = vpop.permute.xlu0 %1189 }
 0x2a2   : > { %1237 = vst.msk [vmem:[#allocation2 + $0x598] sm:$0xff] %vm502_vm1, %v1192_v55  ;;  %1236 = vst.msk [vmem:[#allocation2 + $0x590] sm:$0xff] %vm502_vm1, %v1190_v56 }
 0x2a5   : > { %v1196_v57 = vpop.permute.xlu1 %1195  ;;  %v1194_v58 = vpop.permute.xlu0 %1193 }
 0x2a6   : > { %1239 = vst.msk [vmem:[#allocation2 + $0x5a8] sm:$0xff] %vm502_vm1, %v1196_v57  ;;  %1238 = vst.msk [vmem:[#allocation2 + $0x5a0] sm:$0xff] %vm502_vm1, %v1194_v58 }
 0x2a9   : > { %v1200_v59 = vpop.permute.xlu1 %1199  ;;  %v1198_v60 = vpop.permute.xlu0 %1197 }
 0x2aa   : > { %1241 = vst.msk [vmem:[#allocation2 + $0x5b8] sm:$0xff] %vm502_vm1, %v1200_v59  ;;  %1240 = vst.msk [vmem:[#allocation2 + $0x5b0] sm:$0xff] %vm502_vm1, %v1198_v60 }
 0x2ad   : > { %v1204_v61 = vpop.permute.xlu1 %1203  ;;  %v1202_v62 = vpop.permute.xlu0 %1201 }
 0x2ae   : > { %1243 = vst.msk [vmem:[#allocation2 + $0x5c8] sm:$0xff] %vm502_vm1, %v1204_v61  ;;  %1242 = vst.msk [vmem:[#allocation2 + $0x5c0] sm:$0xff] %vm502_vm1, %v1202_v62 }
 0x2b1   : > { %v1208_v63 = vpop.permute.xlu1 %1207  ;;  %v1206_v0 = vpop.permute.xlu0 %1205 }
 0x2b2   : > { %1245 = vst.msk [vmem:[#allocation2 + $0x5d8] sm:$0xff] %vm502_vm1, %v1208_v63  ;;  %1244 = vst.msk [vmem:[#allocation2 + $0x5d0] sm:$0xff] %vm502_vm1, %v1206_v0 }
 0x2b5   : > { %v1212_v23 = vpop.permute.xlu1 %1211  ;;  %v1210_v27 = vpop.permute.xlu0 %1209 }
 0x2b6   : > { %1247 = vst.msk [vmem:[#allocation2 + $0x5e8] sm:$0xff] %vm502_vm1, %v1212_v23  ;;  %1246 = vst.msk [vmem:[#allocation2 + $0x5e0] sm:$0xff] %vm502_vm1, %v1210_v27 }
 0x2b9   : > { %v1216_v31 = vpop.permute.xlu1 %1215  ;;  %v1214_v35 = vpop.permute.xlu0 %1213 }
 0x2ba   : > { %1249 = vst.msk [vmem:[#allocation2 + $0x5f8] sm:$0xff] %vm502_vm1, %v1216_v31  ;;  %1248 = vst.msk [vmem:[#allocation2 + $0x5f0] sm:$0xff] %vm502_vm1, %v1214_v35 }
 0x2bb PF: > { %s2560_s12 = sshll.u32 %s3179_s24, 7  ;;  %vm1306_vm2 = vcmask 64512   ;;  %v1580_v21 = vlaneseq }
 0x2bc   : > { %s3998_s18 = scalar_lea.vmem [#allocation2], %s2560_s12 }
 0x2bd   : > { %v4080_v25 = vand.u32 127, %v1580_v21 }
 0x2bf   : > { %vm1582_vm3 = vcmp.lt.s32.totalorder %v4080_v25, 16 }
 0x2c1   : > { %v2577_v39 = vld [vmem:[%s3998_s18 + $0x278] sm:$0xff]  ;;  %v2576_v43 = vld [vmem:[%s3998_s18 + $0x270] sm:$0xff]  ;;  %v2575_v46 = vld [vmem:[%s3998_s18 + $0x268] sm:$0xff] }
 0x2c2   : > { %2792 = vmatprep.subr.msk.mxu0 %vm1306_vm2, %v2577_v39  ;;  %v1252_v48 = vld [vmem:[%s3998_s18] sm:$0xff]  ;;  %v2573_v28 = vld [vmem:[%s3998_s18 + $0x258] sm:$0xff]  ;;  %v2572_v32 = vld [vmem:[%s3998_s18 + $0x250] sm:$0xff] }
 0x2c3   : > { %2793 = vmatpush3.xpose.msk.msra.mxu0 %vm1306_vm2, %v2577_v39  ;;  %2824 = vmatprep.mubr.msk.f32.mxu0 %vm1306_vm2, %v1252_v48  ;;  %v2574_v24 = vld [vmem:[%s3998_s18 + $0x260] sm:$0xff]  ;;  %v2571_v36 = vld [vmem:[%s3998_s18 + $0x248] sm:$0xff]  ;;  %v2569_v44 = vld [vmem:[%s3998_s18 + $0x238] sm:$0xff] }
 0x2c4   : > { %2794 = vmatprep.subr.msk.mxu0 %vm1306_vm2, %v2576_v43  ;;  %v2570_v40 = vld [vmem:[%s3998_s18 + $0x240] sm:$0xff]  ;;  %v2568_v1 = vld [vmem:[%s3998_s18 + $0x230] sm:$0xff]  ;;  %v2567_v2 = vld [vmem:[%s3998_s18 + $0x228] sm:$0xff] }
 0x2c5   : > { %v2566_v50 = vld [vmem:[%s3998_s18 + $0x220] sm:$0xff]  ;;  %v2565_v52 = vld [vmem:[%s3998_s18 + $0x218] sm:$0xff]  ;;  %v2564_v3 = vld [vmem:[%s3998_s18 + $0x210] sm:$0xff] }
 0x2c6   : > { %v2563_v4 = vld [vmem:[%s3998_s18 + $0x208] sm:$0xff]  ;;  %v2562_v5 = vld [vmem:[%s3998_s18 + $0x200] sm:$0xff]  ;;  %v1254_v7 = vld [vmem:[%s3998_s18 + $0x10] sm:$0xff] }
 0x2c7   : > { %2795 = vmatpush3.xpose.msk.msra.mxu0 %vm1306_vm2, %v2576_v43  ;;  %v1253_v6 = vld [vmem:[%s3998_s18 + $0x8] sm:$0xff]  ;;  %v1255_v8 = vld [vmem:[%s3998_s18 + $0x18] sm:$0xff]  ;;  %v1256_v9 = vld [vmem:[%s3998_s18 + $0x20] sm:$0xff] }
 0x2c8   : > { %2796 = vmatprep.subr.msk.mxu0 %vm1306_vm2, %v2575_v46  ;;  %v1257_v10 = vld [vmem:[%s3998_s18 + $0x28] sm:$0xff]  ;;  %v1258_v11 = vld [vmem:[%s3998_s18 + $0x30] sm:$0xff]  ;;  %v1259_v12 = vld [vmem:[%s3998_s18 + $0x38] sm:$0xff] }
 0x2c9   : > { %v1260_v13 = vld [vmem:[%s3998_s18 + $0x40] sm:$0xff]  ;;  %v1261_v14 = vld [vmem:[%s3998_s18 + $0x48] sm:$0xff]  ;;  %v1262_v15 = vld [vmem:[%s3998_s18 + $0x50] sm:$0xff] }
 0x2ca   : > { %v1263_v16 = vld [vmem:[%s3998_s18 + $0x58] sm:$0xff]  ;;  %v1264_v17 = vld [vmem:[%s3998_s18 + $0x60] sm:$0xff]  ;;  %v1265_v18 = vld [vmem:[%s3998_s18 + $0x68] sm:$0xff] }
 0x2cb   : > { %2797 = vmatpush3.xpose.msk.msra.mxu0 %vm1306_vm2, %v2575_v46  ;;  %v1266_v19 = vld [vmem:[%s3998_s18 + $0x70] sm:$0xff]  ;;  %v1267_v20 = vld [vmem:[%s3998_s18 + $0x78] sm:$0xff] }
 0x2cc   : > { %2798 = vmatprep.subr.msk.mxu0 %vm1306_vm2, %v2574_v24 }
 0x2cf   : > { %2799 = vmatpush3.xpose.msk.msra.mxu0 %vm1306_vm2, %v2574_v24 }
 0x2d0   : > { %2800 = vmatprep.subr.msk.mxu0 %vm1306_vm2, %v2573_v28 }
 0x2d3   : > { %2801 = vmatpush3.xpose.msk.msra.mxu0 %vm1306_vm2, %v2573_v28 }
 0x2d4   : > { %2802 = vmatprep.subr.msk.mxu0 %vm1306_vm2, %v2572_v32 }
 0x2d7   : > { %2803 = vmatpush3.xpose.msk.msra.mxu0 %vm1306_vm2, %v2572_v32 }
 0x2d8   : > { %2804 = vmatprep.subr.msk.mxu0 %vm1306_vm2, %v2571_v36 }
 0x2db   : > { %2805 = vmatpush3.xpose.msk.msra.mxu0 %vm1306_vm2, %v2571_v36 }
 0x2dc   : > { %2806 = vmatprep.subr.msk.mxu0 %vm1306_vm2, %v2570_v40 }
 0x2df   : > { %2807 = vmatpush3.xpose.msk.msra.mxu0 %vm1306_vm2, %v2570_v40 }
 0x2e0   : > { %2808 = vmatprep.subr.msk.mxu0 %vm1306_vm2, %v2569_v44 }
 0x2e3   : > { %2809 = vmatpush3.xpose.msk.msra.mxu0 %vm1306_vm2, %v2569_v44 }
 0x2e4   : > { %2810 = vmatprep.subr.msk.mxu0 %vm1306_vm2, %v2568_v1 }
 0x2e7   : > { %2811 = vmatpush3.xpose.msk.msra.mxu0 %vm1306_vm2, %v2568_v1 }
 0x2e8   : > { %2812 = vmatprep.subr.msk.mxu0 %vm1306_vm2, %v2567_v2 }
 0x2eb   : > { %2813 = vmatpush3.xpose.msk.msra.mxu0 %vm1306_vm2, %v2567_v2 }
 0x2ec   : > { %2814 = vmatprep.subr.msk.mxu0 %vm1306_vm2, %v2566_v50 }
 0x2ef   : > { %2815 = vmatpush3.xpose.msk.msra.mxu0 %vm1306_vm2, %v2566_v50 }
 0x2f0   : > { %2816 = vmatprep.subr.msk.mxu0 %vm1306_vm2, %v2565_v52 }
 0x2f3   : > { %2817 = vmatpush3.xpose.msk.msra.mxu0 %vm1306_vm2, %v2565_v52 }
 0x2f4   : > { %2818 = vmatprep.subr.msk.mxu0 %vm1306_vm2, %v2564_v3 }
 0x2f7   : > { %2819 = vmatpush3.xpose.msk.msra.mxu0 %vm1306_vm2, %v2564_v3 }
 0x2f8   : > { %2820 = vmatprep.subr.msk.mxu0 %vm1306_vm2, %v2563_v4 }
 0x2fb   : > { %2821 = vmatpush3.xpose.msk.msra.mxu0 %vm1306_vm2, %v2563_v4 }
 0x2fc   : > { %2822 = vmatprep.subr.msk.mxu0 %vm1306_vm2, %v2562_v5 }
 0x2ff   : > { %2823 = vmatpush3.xpose.msk.msra.mxu0 %vm1306_vm2, %v2562_v5 }
 0x302   : > { %2825 = vmatmul.mubr.msk.f32.vlgmr.msra.gmra.mxu0 %vm1306_vm2, %v1253_v6 }
 0x303   : > { %2827 = vmatprep.mubr.msk.f32.mxu0 %vm1306_vm2, %v1254_v7  ;;  %v2594_v7 = vld [vmem:[%s3998_s18 + $0x478] sm:$0xff] }
 0x304   : > { %2848 = vmatprep.subr.mxu1 %v2594_v7 }
 0x305   : > { %2849 = vmatpush3.msra.mxu1 %v2594_v7 }
 0x306   : > { %2828 = vmatmul.mubr.msk.f32.gmra.mxu0 %vm1306_vm2, %v1255_v8  ;;  %v2593_v8 = vld [vmem:[%s3998_s18 + $0x470] sm:$0xff] }
 0x307   : > { %2830 = vmatprep.mubr.msk.f32.mxu0 %vm1306_vm2, %v1256_v9  ;;  %v2592_v9 = vld [vmem:[%s3998_s18 + $0x468] sm:$0xff]  ;;  %2850 = vmatprep.subr.mxu1 %v2593_v8 }
 0x308   : > { %2851 = vmatpush3.msra.mxu1 %v2593_v8  ;;  %v2585_v8 = vld [vmem:[%s3998_s18 + $0x430] sm:$0xff] }
 0x309   : > { %2852 = vmatprep.subr.mxu1 %v2592_v9 }
 0x30a   : > { %2831 = vmatmul.mubr.msk.f32.gmra.mxu0 %vm1306_vm2, %v1257_v10  ;;  %v2591_v10 = vld [vmem:[%s3998_s18 + $0x460] sm:$0xff]  ;;  %2853 = vmatpush3.msra.mxu1 %v2592_v9 }
 0x30b   : > { %2833 = vmatprep.mubr.msk.f32.mxu0 %vm1306_vm2, %v1258_v11  ;;  %v2590_v11 = vld [vmem:[%s3998_s18 + $0x458] sm:$0xff]  ;;  %2854 = vmatprep.subr.mxu1 %v2591_v10 }
 0x30c   : > { %2855 = vmatpush3.msra.mxu1 %v2591_v10 }
 0x30d   : > { %2856 = vmatprep.subr.mxu1 %v2590_v11 }
 0x30e   : > { %2834 = vmatmul.mubr.msk.f32.gmra.mxu0 %vm1306_vm2, %v1259_v12  ;;  %v2589_v12 = vld [vmem:[%s3998_s18 + $0x450] sm:$0xff]  ;;  %2857 = vmatpush3.msra.mxu1 %v2590_v11 }
 0x30f   : > { %2836 = vmatprep.mubr.msk.f32.mxu0 %vm1306_vm2, %v1260_v13  ;;  %2858 = vmatprep.subr.mxu1 %v2589_v12 }
 0x310   : > { %2859 = vmatpush3.msra.mxu1 %v2589_v12  ;;  %v2583_v12 = vld [vmem:[%s3998_s18 + $0x420] sm:$0xff] }
 0x312   : > { %2837 = vmatmul.mubr.msk.f32.gmra.mxu0 %vm1306_vm2, %v1261_v14 }
 0x313   : > { %2839 = vmatprep.mubr.msk.f32.mxu0 %vm1306_vm2, %v1262_v15 }
 0x316   : > { %2840 = vmatmul.mubr.msk.f32.gmra.mxu0 %vm1306_vm2, %v1263_v16 }
 0x317   : > { %2842 = vmatprep.mubr.msk.f32.mxu0 %vm1306_vm2, %v1264_v17 }
 0x31a   : > { %2843 = vmatmul.mubr.msk.f32.gmra.mxu0 %vm1306_vm2, %v1265_v18 }
 0x31b   : > { %2845 = vmatprep.mubr.msk.f32.mxu0 %vm1306_vm2, %v1266_v19 }
 0x31e   : > { %2846 = vmatmul.mubr.msk.f32.gmra.mxu0 %vm1306_vm2, %v1267_v20 }
 0x3c2   : > { %v2826_v22 = vpop.f32.mrf.mxu0 }
 0x3c3   : > { %v1549_v26 = vmul.f32 0.35355338, %v2826_v22 }
 0x3c4   : > { %v1469_v29 = vpop.f32.mrf.mxu0 }
 0x3c5   : > { %1565 = vst [vmem:[%s3335_s14 + $0x8] sm:$0xff] %v1549_v26  ;;  %v1548_v30 = vmul.f32 0.35355338, %v1469_v29  ;;  %v4094_v47 = vsel %vm1582_vm3, %v1549_v26, -inf }
 0x3c6   : > { %v2829_v33 = vpop.f32.mrf.mxu0 }
 0x3c7   : > { %1564 = vst [vmem:[%s3335_s14] sm:$0xff] %v1548_v30  ;;  %v1551_v34 = vmul.f32 0.35355338, %v2829_v33  ;;  %v4087_v37 = vsel %vm1582_vm3, %v1548_v30, -inf }
 0x3c8   : > { %1599 = vmax.xlane.f32.xlu0 %v4087_v37  ;;  %v1479_v38 = vpop.f32.mrf.mxu0 }
 0x3c9   : > { %1567 = vst [vmem:[%s3335_s14 + $0x18] sm:$0xff] %v1551_v34  ;;  %v1550_v41 = vmul.f32 0.35355338, %v1479_v38  ;;  %v4106_v56 = vsel %vm1582_vm3, %v1551_v34, -inf }
 0x3ca   : > { %v2832_v42 = vpop.f32.mrf.mxu0 }
 0x3cb   : > { %1566 = vst [vmem:[%s3335_s14 + $0x10] sm:$0xff] %v1550_v41  ;;  %v1553_v45 = vmul.f32 0.35355338, %v2832_v42  ;;  %v4098_v49 = vsel %vm1582_vm3, %v1550_v41, -inf }
 0x3cc   : > { %1601 = vmax.xlane.f32.xlu0 %v4094_v47  ;;  %1603 = vmax.xlane.f32.xlu1 %v4098_v49  ;;  %v1489_v51 = vpop.f32.mrf.mxu0 }
 0x3cd   : > { %1569 = vst [vmem:[%s3335_s14 + $0x28] sm:$0xff] %v1553_v45  ;;  %v1552_v53 = vmul.f32 0.35355338, %v1489_v51  ;;  %v4118_v62 = vsel %vm1582_vm3, %v1553_v45, -inf }
 0x3ce   : > { %v2835_v54 = vpop.f32.mrf.mxu0 }
 0x3cf   : > { %1568 = vst [vmem:[%s3335_s14 + $0x20] sm:$0xff] %v1552_v53  ;;  %v1555_v55 = vmul.f32 0.35355338, %v2835_v54  ;;  %v4110_v57 = vsel %vm1582_vm3, %v1552_v53, -inf }
 0x3d0   : > { %1605 = vmax.xlane.f32.xlu1 %v4106_v56  ;;  %1607 = vmax.xlane.f32.xlu0 %v4110_v57  ;;  %v1499_v58 = vpop.f32.mrf.mxu0 }
 0x3d1   : > { %1571 = vst [vmem:[%s3335_s14 + $0x38] sm:$0xff] %v1555_v55  ;;  %v1554_v59 = vmul.f32 0.35355338, %v1499_v58  ;;  %v4130_v35 = vsel %vm1582_vm3, %v1555_v55, -inf }
 0x3d2   : > { %v2838_v60 = vpop.f32.mrf.mxu0 }
 0x3d3   : > { %1570 = vst [vmem:[%s3335_s14 + $0x30] sm:$0xff] %v1554_v59  ;;  %v1557_v61 = vmul.f32 0.35355338, %v2838_v60  ;;  %v4122_v63 = vsel %vm1582_vm3, %v1554_v59, -inf }
 0x3d4   : > { %1609 = vmax.xlane.f32.xlu1 %v4118_v62  ;;  %1611 = vmax.xlane.f32.xlu0 %v4122_v63  ;;  %v1509_v0 = vpop.f32.mrf.mxu0 }
 0x3d5   : > { %1573 = vst [vmem:[%s3335_s14 + $0x48] sm:$0xff] %v1557_v61  ;;  %v1556_v23 = vmul.f32 0.35355338, %v1509_v0  ;;  %v4142_v28 = vsel %vm1582_vm3, %v1557_v61, -inf }
 0x3d6   : > { %v2841_v27 = vpop.f32.mrf.mxu0 }
 0x3d7   : > { %1572 = vst [vmem:[%s3335_s14 + $0x40] sm:$0xff] %v1556_v23  ;;  %v1559_v31 = vmul.f32 0.35355338, %v2841_v27  ;;  %v4134_v39 = vsel %vm1582_vm3, %v1556_v23, -inf }
 0x3d8   : > { %1613 = vmax.xlane.f32.xlu1 %v4130_v35  ;;  %1615 = vmax.xlane.f32.xlu0 %v4134_v39  ;;  %v1519_v43 = vpop.f32.mrf.mxu0 }
 0x3d9   : > { %1575 = vst [vmem:[%s3335_s14 + $0x58] sm:$0xff] %v1559_v31  ;;  %v1558_v46 = vmul.f32 0.35355338, %v1519_v43  ;;  %v4154_v2 = vsel %vm1582_vm3, %v1559_v31, -inf }
 0x3da   : > { %v2844_v48 = vpop.f32.mrf.mxu0 }
 0x3db   : > { %1574 = vst [vmem:[%s3335_s14 + $0x50] sm:$0xff] %v1558_v46  ;;  %v1561_v24 = vmul.f32 0.35355338, %v2844_v48  ;;  %v4146_v32 = vsel %vm1582_vm3, %v1558_v46, -inf }
 0x3dc   : > { %1617 = vmax.xlane.f32.xlu1 %v4142_v28  ;;  %1619 = vmax.xlane.f32.xlu0 %v4146_v32  ;;  %v1529_v36 = vpop.f32.mrf.mxu0 }
 0x3dd   : > { %1577 = vst [vmem:[%s3335_s14 + $0x68] sm:$0xff] %v1561_v24  ;;  %v1560_v40 = vmul.f32 0.35355338, %v1529_v36  ;;  %v4166_v4 = vsel %vm1582_vm3, %v1561_v24, -inf }
 0x3de   : > { %v2847_v44 = vpop.f32.mrf.mxu0 }
 0x3df   : > { %1576 = vst [vmem:[%s3335_s14 + $0x60] sm:$0xff] %v1560_v40  ;;  %v1563_v1 = vmul.f32 0.35355338, %v2847_v44  ;;  %v4158_v50 = vsel %vm1582_vm3, %v1560_v40, -inf  ;;  %v2588_v40 = vld [vmem:[%s3998_s18 + $0x448] sm:$0xff]  ;;  %v2587_v44 = vld [vmem:[%s3998_s18 + $0x440] sm:$0xff] }
 0x3e0   : > { %1621 = vmax.xlane.f32.xlu1 %v4154_v2  ;;  %1623 = vmax.xlane.f32.xlu0 %v4158_v50  ;;  %v1539_v52 = vpop.f32.mrf.mxu0 }
 0x3e1   : > { %1579 = vst [vmem:[%s3335_s14 + $0x78] sm:$0xff] %v1563_v1  ;;  %v1562_v3 = vmul.f32 0.35355338, %v1539_v52  ;;  %v4176_v6 = vsel %vm1582_vm3, %v1563_v1, -inf  ;;  %2860 = vmatprep.subr.mxu1 %v2588_v40 }
 0x3e2   : > { %2861 = vmatpush3.msra.mxu1 %v2588_v40 }
 0x3e3   : > { %1578 = vst [vmem:[%s3335_s14 + $0x70] sm:$0xff] %v1562_v3  ;;  %v4170_v5 = vsel %vm1582_vm3, %v1562_v3, -inf  ;;  %2862 = vmatprep.subr.mxu1 %v2587_v44 }
 0x3e4   : > { %1625 = vmax.xlane.f32.xlu1 %v4166_v4  ;;  %1627 = vmax.xlane.f32.xlu0 %v4170_v5 }
 0x3e5   : > { %2863 = vmatpush3.msra.mxu1 %v2587_v44 }
 0x3e8   : > { %1629 = vmax.xlane.f32.xlu1 %v4176_v6 }
 0x451   : > { %v1600_v13 = vpop.xlane.xlu0 %1599 }
 0x452   : > { %v1631_v14 = vsub.f32 %v4087_v37, %v1600_v13 }
 0x454   : > { %v1647_v15 = vmul.f32 1.442695, %v1631_v14  ;;  %v2582_v14 = vld [vmem:[%s3998_s18 + $0x418] sm:$0xff] }
 0x455   : > { %v1602_v16 = vpop.xlane.xlu0 %1601  ;;  %v1604_v17 = vpop.xlane.xlu1 %1603 }
 0x456   : > { %3039 = vpow2.f32 %v1647_v15  ;;  %v1632_v18 = vsub.f32 %v4094_v47, %v1602_v16  ;;  %v1633_v19 = vsub.f32 %v4098_v49, %v1604_v17  ;;  %v2581_v16 = vld [vmem:[%s3998_s18 + $0x410] sm:$0xff] }
 0x458   : > { %v1649_v20 = vmul.f32 1.442695, %v1632_v18  ;;  %v1651_v21 = vmul.f32 1.442695, %v1633_v19  ;;  %v2580_v18 = vld [vmem:[%s3998_s18 + $0x408] sm:$0xff] }
 0x459   : > { %v1606_v22 = vpop.xlane.xlu1 %1605  ;;  %v1608_v25 = vpop.xlane.xlu0 %1607 }
 0x45a   : > { %3041 = vpow2.f32 %v1649_v20  ;;  %v1634_v26 = vsub.f32 %v4106_v56, %v1606_v22  ;;  %v1635_v29 = vsub.f32 %v4110_v57, %v1608_v25  ;;  %v2579_v20 = vld [vmem:[%s3998_s18 + $0x400] sm:$0xff] }
 0x45b   : > { %3043 = vpow2.f32 %v1651_v21 }
 0x45c   : > { %v1653_v30 = vmul.f32 1.442695, %v1634_v26  ;;  %v1655_v33 = vmul.f32 1.442695, %v1635_v29 }
 0x45d   : > { %v1610_v34 = vpop.xlane.xlu1 %1609  ;;  %v1612_v37 = vpop.xlane.xlu0 %1611 }
 0x45e   : > { %3045 = vpow2.f32 %v1653_v30  ;;  %v1636_v38 = vsub.f32 %v4118_v62, %v1610_v34  ;;  %v1637_v41 = vsub.f32 %v4122_v63, %v1612_v37 }
 0x45f   : > { %3047 = vpow2.f32 %v1655_v33 }
 0x460   : > { %v1657_v42 = vmul.f32 1.442695, %v1636_v38  ;;  %v1659_v45 = vmul.f32 1.442695, %v1637_v41 }
 0x461   : > { %v1614_v47 = vpop.xlane.xlu1 %1613  ;;  %v1616_v49 = vpop.xlane.xlu0 %1615 }
 0x462   : > { %3049 = vpow2.f32 %v1657_v42  ;;  %v1638_v51 = vsub.f32 %v4130_v35, %v1614_v47  ;;  %v1639_v53 = vsub.f32 %v4134_v39, %v1616_v49 }
 0x463   : > { %v4194_v54 = vpop.eup %3039  ;;  %3051 = vpow2.f32 %v1659_v45 }
 0x464   : > { %v1661_v55 = vmul.f32 1.442695, %v1638_v51  ;;  %v1663_v56 = vmul.f32 1.442695, %v1639_v53  ;;  %1679 = vadd.xlane.f32.xlu0 %v4194_v54 }
 0x465   : > { %v1618_v57 = vpop.xlane.xlu1 %1617  ;;  %v1620_v58 = vpop.xlane.xlu0 %1619 }
 0x466   : > { %3053 = vpow2.f32 %v1661_v55  ;;  %v1640_v59 = vsub.f32 %v4142_v28, %v1618_v57  ;;  %v1641_v60 = vsub.f32 %v4146_v32, %v1620_v58 }
 0x467   : > { %v4199_v61 = vpop.eup %3041  ;;  %3055 = vpow2.f32 %v1663_v56 }
 0x468   : > { %v4201_v62 = vpop.eup %3043  ;;  %v1665_v63 = vmul.f32 1.442695, %v1640_v59  ;;  %v1667_v0 = vmul.f32 1.442695, %v1641_v60  ;;  %1681 = vadd.xlane.f32.xlu1 %v4199_v61 }
 0x469   : > { %1683 = vadd.xlane.f32.xlu0 %v4201_v62  ;;  %v1622_v23 = vpop.xlane.xlu1 %1621  ;;  %v1624_v27 = vpop.xlane.xlu0 %1623 }
 0x46a   : > { %3057 = vpow2.f32 %v1665_v63  ;;  %v1642_v31 = vsub.f32 %v4154_v2, %v1622_v23  ;;  %v1643_v35 = vsub.f32 %v4158_v50, %v1624_v27 }
 0x46b   : > { %v4207_v39 = vpop.eup %3045  ;;  %3059 = vpow2.f32 %v1667_v0 }
 0x46c   : > { %v4209_v43 = vpop.eup %3047  ;;  %v1669_v46 = vmul.f32 1.442695, %v1642_v31  ;;  %v1671_v48 = vmul.f32 1.442695, %v1643_v35  ;;  %1685 = vadd.xlane.f32.xlu1 %v4207_v39 }
 0x46d   : > { %1687 = vadd.xlane.f32.xlu0 %v4209_v43  ;;  %v1626_v24 = vpop.xlane.xlu1 %1625  ;;  %v1628_v28 = vpop.xlane.xlu0 %1627 }
 0x46e   : > { %3061 = vpow2.f32 %v1669_v46  ;;  %v1644_v32 = vsub.f32 %v4166_v4, %v1626_v24  ;;  %v1645_v36 = vsub.f32 %v4170_v5, %v1628_v28  ;;  %v2586_v5 = vld [vmem:[%s3998_s18 + $0x438] sm:$0xff] }
 0x46f   : > { %v4217_v1 = vpop.eup %3049  ;;  %3063 = vpow2.f32 %v1671_v48  ;;  %2864 = vmatprep.subr.mxu1 %v2586_v5 }
 0x470   : > { %v4219_v2 = vpop.eup %3051  ;;  %v1673_v50 = vmul.f32 1.442695, %v1644_v32  ;;  %v1675_v52 = vmul.f32 1.442695, %v1645_v36  ;;  %1689 = vadd.xlane.f32.xlu1 %v4217_v1  ;;  %2865 = vmatpush3.msra.mxu1 %v2586_v5 }
 0x471   : > { %1691 = vadd.xlane.f32.xlu0 %v4219_v2  ;;  %v1630_v3 = vpop.xlane.xlu1 %1629  ;;  %2866 = vmatprep.subr.mxu1 %v2585_v8 }
 0x472   : > { %3065 = vpow2.f32 %v1673_v50  ;;  %v1646_v4 = vsub.f32 %v4176_v6, %v1630_v3  ;;  %2867 = vmatpush3.msra.mxu1 %v2585_v8  ;;  %v2584_v6 = vld [vmem:[%s3998_s18 + $0x428] sm:$0xff] }
 0x473   : > { %v4225_v7 = vpop.eup %3053  ;;  %3067 = vpow2.f32 %v1675_v52  ;;  %2868 = vmatprep.subr.mxu1 %v2584_v6 }
 0x474   : > { %v4228_v9 = vpop.eup %3055  ;;  %v1677_v10 = vmul.f32 1.442695, %v1646_v4  ;;  %1693 = vadd.xlane.f32.xlu1 %v4225_v7  ;;  %2869 = vmatpush3.msra.mxu1 %v2584_v6 }
 0x475   : > { %1695 = vadd.xlane.f32.xlu0 %v4228_v9  ;;  %2870 = vmatprep.subr.mxu1 %v2583_v12 }
 0x476   : > { %3069 = vpow2.f32 %v1677_v10  ;;  %2871 = vmatpush3.msra.mxu1 %v2583_v12 }
 0x477   : > { %v4233_v11 = vpop.eup %3057  ;;  %2872 = vmatprep.subr.mxu1 %v2582_v14 }
 0x478   : > { %v4236_v13 = vpop.eup %3059  ;;  %1697 = vadd.xlane.f32.xlu1 %v4233_v11  ;;  %2873 = vmatpush3.msra.mxu1 %v2582_v14 }
 0x479   : > { %1699 = vadd.xlane.f32.xlu0 %v4236_v13  ;;  %2874 = vmatprep.subr.mxu1 %v2581_v16 }
 0x47a   : > { %2875 = vmatpush3.msra.mxu1 %v2581_v16 }
 0x47b   : > { %v4241_v15 = vpop.eup %3061  ;;  %2876 = vmatprep.subr.mxu1 %v2580_v18 }
 0x47c   : > { %v4244_v17 = vpop.eup %3063  ;;  %1701 = vadd.xlane.f32.xlu1 %v4241_v15  ;;  %2877 = vmatpush3.msra.mxu1 %v2580_v18 }
 0x47d   : > { %1703 = vadd.xlane.f32.xlu0 %v4244_v17  ;;  %2878 = vmatprep.subr.mxu1 %v2579_v20 }
 0x47e   : > { %2879 = vmatpush3.msra.mxu1 %v2579_v20 }
 0x47f   : > { %v4249_v19 = vpop.eup %3065 }
 0x480   : > { %v4252_v21 = vpop.eup %3067  ;;  %1705 = vadd.xlane.f32.xlu1 %v4249_v19 }
 0x481   : > { %1707 = vadd.xlane.f32.xlu0 %v4252_v21 }
 0x483   : > { %v4256_v22 = vpop.eup %3069 }
 0x484   : > { %1709 = vadd.xlane.f32.xlu1 %v4256_v22 }
 0x4ed   : > { %v1680_v25 = vpop.xlane.xlu0 %1679 }
 0x4ee   : > { %3071 = vrcp.f32 %v1680_v25 }
 0x4f1   : > { %v1682_v26 = vpop.xlane.xlu1 %1681 }
 0x4f2   : > { %3073 = vrcp.f32 %v1682_v26  ;;  %v1684_v29 = vpop.xlane.xlu0 %1683 }
 0x4f3   : > { %3075 = vrcp.f32 %v1684_v29 }
 0x4f5   : > { %v1686_v30 = vpop.xlane.xlu1 %1685 }
 0x4f6   : > { %3077 = vrcp.f32 %v1686_v30  ;;  %v1688_v33 = vpop.xlane.xlu0 %1687 }
 0x4f7   : > { %3079 = vrcp.f32 %v1688_v33 }
 0x4f9   : > { %v1690_v34 = vpop.xlane.xlu1 %1689 }
 0x4fa   : > { %3081 = vrcp.f32 %v1690_v34  ;;  %v1692_v37 = vpop.xlane.xlu0 %1691 }
 0x4fb   : > { %v3072_v38 = vpop.eup %3071  ;;  %3083 = vrcp.f32 %v1692_v37 }
 0x4fc   : > { %v1712_v41 = vmul.f32 %v3072_v38, %v4194_v54 }
 0x4fd   : > { %v1694_v42 = vpop.xlane.xlu1 %1693 }
 0x4fe   : > { %3085 = vrcp.f32 %v1694_v42  ;;  %v1696_v45 = vpop.xlane.xlu0 %1695  ;;  %2880 = vmatprep.mubr.f32.mxu1 %v1712_v41 }
 0x4ff   : > { %v3074_v47 = vpop.eup %3073  ;;  %3087 = vrcp.f32 %v1696_v45 }
 0x500   : > { %v3076_v49 = vpop.eup %3075  ;;  %v1714_v51 = vmul.f32 %v3074_v47, %v4199_v61 }
 0x501   : > { %v1698_v53 = vpop.xlane.xlu1 %1697  ;;  %v1716_v55 = vmul.f32 %v3076_v49, %v4201_v62 }
 0x502   : > { %3089 = vrcp.f32 %v1698_v53  ;;  %v1700_v56 = vpop.xlane.xlu0 %1699  ;;  %2881 = vmatmul.mubr.f32.vlgmr.msra.gmra.mxu1 %v1714_v51 }
 0x503   : > { %v3078_v57 = vpop.eup %3077  ;;  %3091 = vrcp.f32 %v1700_v56  ;;  %2883 = vmatprep.mubr.f32.mxu1 %v1716_v55 }
 0x504   : > { %v3080_v58 = vpop.eup %3079  ;;  %v1718_v54 = vmul.f32 %v3078_v57, %v4207_v39 }
 0x505   : > { %v1702_v59 = vpop.xlane.xlu1 %1701  ;;  %v1720_v60 = vmul.f32 %v3080_v58, %v4209_v43 }
 0x506   : > { %3093 = vrcp.f32 %v1702_v59  ;;  %v1704_v63 = vpop.xlane.xlu0 %1703  ;;  %2884 = vmatmul.mubr.f32.gmra.mxu1 %v1718_v54 }
 0x507   : > { %v3082_v0 = vpop.eup %3081  ;;  %3095 = vrcp.f32 %v1704_v63  ;;  %2886 = vmatprep.mubr.f32.mxu1 %v1720_v60 }
 0x508   : > { %v3084_v61 = vpop.eup %3083  ;;  %v1722_v62 = vmul.f32 %v3082_v0, %v4217_v1 }
 0x509   : > { %v1706_v23 = vpop.xlane.xlu1 %1705  ;;  %v1724_v27 = vmul.f32 %v3084_v61, %v4219_v2 }
 0x50a   : > { %3097 = vrcp.f32 %v1706_v23  ;;  %v1708_v31 = vpop.xlane.xlu0 %1707  ;;  %2887 = vmatmul.mubr.f32.gmra.mxu1 %v1722_v62 }
 0x50b   : > { %v3086_v35 = vpop.eup %3085  ;;  %3099 = vrcp.f32 %v1708_v31  ;;  %2889 = vmatprep.mubr.f32.mxu1 %v1724_v27 }
 0x50c   : > { %v3088_v39 = vpop.eup %3087  ;;  %v1726_v43 = vmul.f32 %v3086_v35, %v4225_v7 }
 0x50d   : > { %v1710_v46 = vpop.xlane.xlu1 %1709  ;;  %v1728_v48 = vmul.f32 %v3088_v39, %v4228_v9 }
 0x50e   : > { %3101 = vrcp.f32 %v1710_v46  ;;  %2890 = vmatmul.mubr.f32.gmra.mxu1 %v1726_v43 }
 0x50f   : > { %v3090_v24 = vpop.eup %3089  ;;  %2892 = vmatprep.mubr.f32.mxu1 %v1728_v48 }
 0x510   : > { %v3092_v28 = vpop.eup %3091  ;;  %v1730_v32 = vmul.f32 %v3090_v24, %v4233_v11 }
 0x511   : > { %v1732_v36 = vmul.f32 %v3092_v28, %v4236_v13 }
 0x512   : > { %2893 = vmatmul.mubr.f32.gmra.mxu1 %v1730_v32 }
 0x513   : > { %v3094_v40 = vpop.eup %3093  ;;  %2895 = vmatprep.mubr.f32.mxu1 %v1732_v36 }
 0x514   : > { %v3096_v44 = vpop.eup %3095  ;;  %v1734_v1 = vmul.f32 %v3094_v40, %v4241_v15 }
 0x515   : > { %v1736_v2 = vmul.f32 %v3096_v44, %v4244_v17 }
 0x516   : > { %2896 = vmatmul.mubr.f32.gmra.mxu1 %v1734_v1 }
 0x517   : > { %v3098_v50 = vpop.eup %3097  ;;  %2898 = vmatprep.mubr.f32.mxu1 %v1736_v2 }
 0x518   : > { %v3100_v52 = vpop.eup %3099  ;;  %v1738_v3 = vmul.f32 %v3098_v50, %v4249_v19 }
 0x519   : > { %v1740_v4 = vmul.f32 %v3100_v52, %v4252_v21 }
 0x51a   : > { %2899 = vmatmul.mubr.f32.gmra.mxu1 %v1738_v3 }
 0x51b   : > { %v3102_v5 = vpop.eup %3101  ;;  %2901 = vmatprep.mubr.f32.mxu1 %v1740_v4 }
 0x51c   : > { %v1742_v7 = vmul.f32 %v3102_v5, %v4256_v22 }
 0x51e   : > { %2902 = vmatmul.mubr.f32.gmra.mxu1 %v1742_v7 }
 0x5c2   : > { %v4275_v8 = vpop.f32.mrf.mxu1 }
 0x5c4   : > { %v4277_v9 = vpop.f32.mrf.mxu1 }
 0x5c6   : > { %v4279_v10 = vpop.f32.mrf.mxu1 }
 0x5c8   : > { %v4281_v6 = vpop.f32.mrf.mxu1 }
 0x5ca   : > { %v4283_v11 = vpop.f32.mrf.mxu1 }
 0x5cc   : > { %v4285_v12 = vpop.f32.mrf.mxu1 }
 0x5ce   : > { %v4287_v13 = vpop.f32.mrf.mxu1 }
 0x5d0   : > { %v4289_v14 = vpop.f32.mrf.mxu1 }
 0x5d2   : > { %v4291_v15 = vpop.f32.mrf.mxu1 }
 0x5d4   : > { %v4293_v16 = vpop.f32.mrf.mxu1 }
 0x5d6   : > { %v4295_v17 = vpop.f32.mrf.mxu1 }
 0x5d8   : > { %v4297_v18 = vpop.f32.mrf.mxu1 }
 0x5da   : > { %v4299_v19 = vpop.f32.mrf.mxu1 }
 0x5dc   : > { %v4301_v20 = vpop.f32.mrf.mxu1  ;;  %1890 = sbr.rel (%p2542_p13) target bundleno = 1513 (0x5e9), region = 48 }
 0x5de   : > { %v4303_v21 = vpop.f32.mrf.mxu1 }
 0x5e0   : > { %v4305_v22 = vpop.f32.mrf.mxu1 }
 0x5e1   : > { %1891 = vst.msk [vmem:[#allocation3] sm:$0xff] %vm1306_vm2, %v4277_v9  ;;  %1892 = vst.msk [vmem:[#allocation3 + $0x8] sm:$0xff] %vm1306_vm2, %v4275_v8 }
 0x5e2   : > { %1893 = vst.msk [vmem:[#allocation3 + $0x10] sm:$0xff] %vm1306_vm2, %v4281_v6  ;;  %1894 = vst.msk [vmem:[#allocation3 + $0x18] sm:$0xff] %vm1306_vm2, %v4279_v10 }
 0x5e3   : > { %1895 = vst.msk [vmem:[#allocation3 + $0x20] sm:$0xff] %vm1306_vm2, %v4285_v12  ;;  %1896 = vst.msk [vmem:[#allocation3 + $0x28] sm:$0xff] %vm1306_vm2, %v4283_v11 }
 0x5e4   : > { %1897 = vst.msk [vmem:[#allocation3 + $0x30] sm:$0xff] %vm1306_vm2, %v4289_v14  ;;  %1898 = vst.msk [vmem:[#allocation3 + $0x38] sm:$0xff] %vm1306_vm2, %v4287_v13 }
 0x5e5   : > { %1899 = vst.msk [vmem:[#allocation3 + $0x40] sm:$0xff] %vm1306_vm2, %v4293_v16  ;;  %1900 = vst.msk [vmem:[#allocation3 + $0x48] sm:$0xff] %vm1306_vm2, %v4291_v15 }
 0x5e6   : > { %1901 = vst.msk [vmem:[#allocation3 + $0x50] sm:$0xff] %vm1306_vm2, %v4297_v18  ;;  %1902 = vst.msk [vmem:[#allocation3 + $0x58] sm:$0xff] %vm1306_vm2, %v4295_v17 }
 0x5e7   : > { %1903 = vst.msk [vmem:[#allocation3 + $0x60] sm:$0xff] %vm1306_vm2, %v4301_v20  ;;  %1904 = vst.msk [vmem:[#allocation3 + $0x68] sm:$0xff] %vm1306_vm2, %v4299_v19 }
 0x5e8   : > { %1905 = vst.msk [vmem:[#allocation3 + $0x70] sm:$0xff] %vm1306_vm2, %v4305_v22  ;;  %1906 = vst.msk [vmem:[#allocation3 + $0x78] sm:$0xff] %vm1306_vm2, %v4303_v21 }
 0x5e9 PF: > { %p2628_p0 = scmp.ne.s32.totalorder %s3179_s24, 1 }
 0x5ea   : > { %s3208_s20 = smov (!%p2628_p0), 8  }
 0x5eb   : > { %1910 = sbr.rel (%p2628_p0) target bundleno = 1664 (0x680), region = 52 }
 0x5f0   : > { %1931 = vrot.lane.b32.xlu1 %v4281_v6, %s3208_s20  ;;  %1927 = vrot.lane.b32.xlu0 %v4277_v9, %s3208_s20  ;;  %vm1975_vm4 = vcmask 130112  }
 0x5f4   : > { %1933 = vrot.lane.b32.xlu1 %v4279_v10, %s3208_s20  ;;  %1929 = vrot.lane.b32.xlu0 %v4275_v8, %s3208_s20 }
 0x5f8   : > { %1937 = vrot.lane.b32.xlu1 %v4283_v11, %s3208_s20  ;;  %1935 = vrot.lane.b32.xlu0 %v4285_v12, %s3208_s20 }
 0x5fc   : > { %1941 = vrot.lane.b32.xlu1 %v4287_v13, %s3208_s20  ;;  %1939 = vrot.lane.b32.xlu0 %v4289_v14, %s3208_s20 }
 0x600   : > { %1945 = vrot.lane.b32.xlu1 %v4291_v15, %s3208_s20  ;;  %1943 = vrot.lane.b32.xlu0 %v4293_v16, %s3208_s20 }
 0x604   : > { %1949 = vrot.lane.b32.xlu1 %v4295_v17, %s3208_s20  ;;  %1947 = vrot.lane.b32.xlu0 %v4297_v18, %s3208_s20 }
 0x608   : > { %1953 = vrot.lane.b32.xlu1 %v4299_v19, %s3208_s20  ;;  %1951 = vrot.lane.b32.xlu0 %v4301_v20, %s3208_s20 }
 0x60c   : > { %1957 = vrot.lane.b32.xlu1 %v4303_v21, %s3208_s20  ;;  %1955 = vrot.lane.b32.xlu0 %v4305_v22, %s3208_s20 }
 0x662   : > { %v1932_v25 = vpop.permute.xlu1 %1931  ;;  %v1928_v26 = vpop.permute.xlu0 %1927 }
 0x663   : > { %1978 = vst.msk [vmem:[#allocation3 + $0x10] sm:$0xff] %vm1975_vm4, %v1932_v25  ;;  %1976 = vst.msk [vmem:[#allocation3] sm:$0xff] %vm1975_vm4, %v1928_v26 }
 0x666   : > { %v1934_v29 = vpop.permute.xlu1 %1933  ;;  %v1930_v30 = vpop.permute.xlu0 %1929 }
 0x667   : > { %1979 = vst.msk [vmem:[#allocation3 + $0x18] sm:$0xff] %vm1975_vm4, %v1934_v29  ;;  %1977 = vst.msk [vmem:[#allocation3 + $0x8] sm:$0xff] %vm1975_vm4, %v1930_v30 }
 0x66a   : > { %v1938_v33 = vpop.permute.xlu1 %1937  ;;  %v1936_v34 = vpop.permute.xlu0 %1935 }
 0x66b   : > { %1981 = vst.msk [vmem:[#allocation3 + $0x28] sm:$0xff] %vm1975_vm4, %v1938_v33  ;;  %1980 = vst.msk [vmem:[#allocation3 + $0x20] sm:$0xff] %vm1975_vm4, %v1936_v34 }
 0x66e   : > { %v1942_v37 = vpop.permute.xlu1 %1941  ;;  %v1940_v38 = vpop.permute.xlu0 %1939 }
 0x66f   : > { %1983 = vst.msk [vmem:[#allocation3 + $0x38] sm:$0xff] %vm1975_vm4, %v1942_v37  ;;  %1982 = vst.msk [vmem:[#allocation3 + $0x30] sm:$0xff] %vm1975_vm4, %v1940_v38 }
 0x672   : > { %v1946_v41 = vpop.permute.xlu1 %1945  ;;  %v1944_v42 = vpop.permute.xlu0 %1943 }
 0x673   : > { %1985 = vst.msk [vmem:[#allocation3 + $0x48] sm:$0xff] %vm1975_vm4, %v1946_v41  ;;  %1984 = vst.msk [vmem:[#allocation3 + $0x40] sm:$0xff] %vm1975_vm4, %v1944_v42 }
 0x676   : > { %v1950_v45 = vpop.permute.xlu1 %1949  ;;  %v1948_v47 = vpop.permute.xlu0 %1947 }
 0x677   : > { %1987 = vst.msk [vmem:[#allocation3 + $0x58] sm:$0xff] %vm1975_vm4, %v1950_v45  ;;  %1986 = vst.msk [vmem:[#allocation3 + $0x50] sm:$0xff] %vm1975_vm4, %v1948_v47 }
 0x67a   : > { %v1954_v49 = vpop.permute.xlu1 %1953  ;;  %v1952_v51 = vpop.permute.xlu0 %1951 }
 0x67b   : > { %1989 = vst.msk [vmem:[#allocation3 + $0x68] sm:$0xff] %vm1975_vm4, %v1954_v49  ;;  %1988 = vst.msk [vmem:[#allocation3 + $0x60] sm:$0xff] %vm1975_vm4, %v1952_v51 }
 0x67e   : > { %v1958_v53 = vpop.permute.xlu1 %1957  ;;  %v1956_v55 = vpop.permute.xlu0 %1955 }
 0x67f   : > { %1991 = vst.msk [vmem:[#allocation3 + $0x78] sm:$0xff] %vm1975_vm4, %v1958_v53  ;;  %1990 = vst.msk [vmem:[#allocation3 + $0x70] sm:$0xff] %vm1975_vm4, %v1956_v55 }
 0x680 PF: > { %p2629_p1 = scmp.ne.s32.totalorder %s3179_s24, 2 }
 0x681   : > { %s3209_s17 = smov (!%p2629_p1), 16  }
 0x682   : > { %1995 = sbr.rel (%p2629_p1) target bundleno = 1815 (0x717), region = 56 }
 0x687   : > { %2016 = vrot.lane.b32.xlu1 %v4281_v6, %s3209_s17  ;;  %2012 = vrot.lane.b32.xlu0 %v4277_v9, %s3209_s17  ;;  %vm2060_vm5 = vcmask 195712  }
 0x68b   : > { %2018 = vrot.lane.b32.xlu1 %v4279_v10, %s3209_s17  ;;  %2014 = vrot.lane.b32.xlu0 %v4275_v8, %s3209_s17 }
 0x68f   : > { %2022 = vrot.lane.b32.xlu1 %v4283_v11, %s3209_s17  ;;  %2020 = vrot.lane.b32.xlu0 %v4285_v12, %s3209_s17 }
 0x693   : > { %2026 = vrot.lane.b32.xlu1 %v4287_v13, %s3209_s17  ;;  %2024 = vrot.lane.b32.xlu0 %v4289_v14, %s3209_s17 }
 0x697   : > { %2030 = vrot.lane.b32.xlu1 %v4291_v15, %s3209_s17  ;;  %2028 = vrot.lane.b32.xlu0 %v4293_v16, %s3209_s17 }
 0x69b   : > { %2034 = vrot.lane.b32.xlu1 %v4295_v17, %s3209_s17  ;;  %2032 = vrot.lane.b32.xlu0 %v4297_v18, %s3209_s17 }
 0x69f   : > { %2038 = vrot.lane.b32.xlu1 %v4299_v19, %s3209_s17  ;;  %2036 = vrot.lane.b32.xlu0 %v4301_v20, %s3209_s17 }
 0x6a3   : > { %2042 = vrot.lane.b32.xlu1 %v4303_v21, %s3209_s17  ;;  %2040 = vrot.lane.b32.xlu0 %v4305_v22, %s3209_s17 }
 0x6f9   : > { %v2017_v56 = vpop.permute.xlu1 %2016  ;;  %v2013_v57 = vpop.permute.xlu0 %2012 }
 0x6fa   : > { %2063 = vst.msk [vmem:[#allocation3 + $0x10] sm:$0xff] %vm2060_vm5, %v2017_v56  ;;  %2061 = vst.msk [vmem:[#allocation3] sm:$0xff] %vm2060_vm5, %v2013_v57 }
 0x6fd   : > { %v2019_v58 = vpop.permute.xlu1 %2018  ;;  %v2015_v54 = vpop.permute.xlu0 %2014 }
 0x6fe   : > { %2064 = vst.msk [vmem:[#allocation3 + $0x18] sm:$0xff] %vm2060_vm5, %v2019_v58  ;;  %2062 = vst.msk [vmem:[#allocation3 + $0x8] sm:$0xff] %vm2060_vm5, %v2015_v54 }
 0x701   : > { %v2023_v59 = vpop.permute.xlu1 %2022  ;;  %v2021_v60 = vpop.permute.xlu0 %2020 }
 0x702   : > { %2066 = vst.msk [vmem:[#allocation3 + $0x28] sm:$0xff] %vm2060_vm5, %v2023_v59  ;;  %2065 = vst.msk [vmem:[#allocation3 + $0x20] sm:$0xff] %vm2060_vm5, %v2021_v60 }
 0x705   : > { %v2027_v63 = vpop.permute.xlu1 %2026  ;;  %v2025_v0 = vpop.permute.xlu0 %2024 }
 0x706   : > { %2068 = vst.msk [vmem:[#allocation3 + $0x38] sm:$0xff] %vm2060_vm5, %v2027_v63  ;;  %2067 = vst.msk [vmem:[#allocation3 + $0x30] sm:$0xff] %vm2060_vm5, %v2025_v0 }
 0x709   : > { %v2031_v61 = vpop.permute.xlu1 %2030  ;;  %v2029_v62 = vpop.permute.xlu0 %2028 }
 0x70a   : > { %2070 = vst.msk [vmem:[#allocation3 + $0x48] sm:$0xff] %vm2060_vm5, %v2031_v61  ;;  %2069 = vst.msk [vmem:[#allocation3 + $0x40] sm:$0xff] %vm2060_vm5, %v2029_v62 }
 0x70d   : > { %v2035_v23 = vpop.permute.xlu1 %2034  ;;  %v2033_v27 = vpop.permute.xlu0 %2032 }
 0x70e   : > { %2072 = vst.msk [vmem:[#allocation3 + $0x58] sm:$0xff] %vm2060_vm5, %v2035_v23  ;;  %2071 = vst.msk [vmem:[#allocation3 + $0x50] sm:$0xff] %vm2060_vm5, %v2033_v27 }
 0x711   : > { %v2039_v31 = vpop.permute.xlu1 %2038  ;;  %v2037_v35 = vpop.permute.xlu0 %2036 }
 0x712   : > { %2074 = vst.msk [vmem:[#allocation3 + $0x68] sm:$0xff] %vm2060_vm5, %v2039_v31  ;;  %2073 = vst.msk [vmem:[#allocation3 + $0x60] sm:$0xff] %vm2060_vm5, %v2037_v35 }
 0x715   : > { %v2043_v39 = vpop.permute.xlu1 %2042  ;;  %v2041_v43 = vpop.permute.xlu0 %2040 }
 0x716   : > { %2076 = vst.msk [vmem:[#allocation3 + $0x78] sm:$0xff] %vm2060_vm5, %v2043_v39  ;;  %2075 = vst.msk [vmem:[#allocation3 + $0x70] sm:$0xff] %vm2060_vm5, %v2041_v43 }
 0x717 PF: > { %p2630_p2 = scmp.ne.s32.totalorder %s3179_s24, 3 }
 0x718   : > { %s3210_s16 = smov (!%p2630_p2), 24  }
 0x719   : > { %2080 = sbr.rel (%p2630_p2) target bundleno = 2172 (0x87c), region = 60 }
 0x71e   : > { %v2181_v46 = vld [vmem:[%s4585_s3 + $0x18] sm:$0xff]  ;;  %2099 = vrot.lane.b32.xlu1 %v4275_v8, %s3210_s16  ;;  %2097 = vrot.lane.b32.xlu0 %v4277_v9, %s3210_s16  ;;  %v2180_v48 = vld [vmem:[%s4585_s3 + $0x10] sm:$0xff]  ;;  %vm2145_vm6 = vcmask 261312   ;;  %vm2189_vm7 = vcmask 261120  }
 0x71f   : > { %2904 = vmatprep.subr.mxu0 %v2181_v46  ;;  %2944 = vmatprep.subr.mxu1 %v2181_v46  ;;  %v2179_v24 = vld [vmem:[%s4585_s3 + $0x8] sm:$0xff]  ;;  %v2178_v28 = vld [vmem:[%s4585_s3] sm:$0xff] }
 0x720   : > { %2905 = vmatpush3.msra.mxu0 %v2181_v46  ;;  %2948 = vmatpush3.msra.mxu1 %v2181_v46  ;;  %v2631_v33 = vld [vmem:[%s4586_s4] ss:$0 sm:$0xff] }
 0x721   : > { %2906 = vmatprep.subr.mxu0 %v2180_v48  ;;  %2945 = vmatprep.subr.mxu1 %v2180_v48 }
 0x722   : > { %2115 = vrot.lane.b32.xlu1 %v4291_v15, %s3210_s16  ;;  %2113 = vrot.lane.b32.xlu0 %v4293_v16, %s3210_s16 }
 0x723   : > { %2907 = vmatpush3.msra.mxu0 %v2180_v48  ;;  %2949 = vmatpush3.msra.mxu1 %v2180_v48 }
 0x724   : > { %2908 = vmatprep.subr.mxu0 %v2179_v24  ;;  %2946 = vmatprep.subr.mxu1 %v2179_v24 }
 0x725   : > { %2909 = vmatpush3.msra.mxu0 %v2179_v24  ;;  %2950 = vmatpush3.msra.mxu1 %v2179_v24 }
 0x726   : > { %2117 = vrot.lane.b32.xlu1 %v4297_v18, %s3210_s16  ;;  %2101 = vrot.lane.b32.xlu0 %v4281_v6, %s3210_s16 }
 0x727   : > { %2910 = vmatprep.subr.mxu0 %v2178_v28  ;;  %2947 = vmatprep.subr.mxu1 %v2178_v28 }
 0x728   : > { %2911 = vmatpush3.msra.mxu0 %v2178_v28  ;;  %2951 = vmatpush3.msra.mxu1 %v2178_v28 }
 0x72a   : > { %2119 = vrot.lane.b32.xlu1 %v4295_v17, %s3210_s16  ;;  %2103 = vrot.lane.b32.xlu0 %v4279_v10, %s3210_s16 }
 0x72e   : > { %2121 = vrot.lane.b32.xlu1 %v4301_v20, %s3210_s16  ;;  %2105 = vrot.lane.b32.xlu0 %v4285_v12, %s3210_s16 }
 0x732   : > { %2123 = vrot.lane.b32.xlu1 %v4299_v19, %s3210_s16  ;;  %2107 = vrot.lane.b32.xlu0 %v4283_v11, %s3210_s16 }
 0x736   : > { %2125 = vrot.lane.b32.xlu1 %v4305_v22, %s3210_s16  ;;  %2109 = vrot.lane.b32.xlu0 %v4289_v14, %s3210_s16 }
 0x73a   : > { %2127 = vrot.lane.b32.xlu1 %v4303_v21, %s3210_s16  ;;  %2111 = vrot.lane.b32.xlu0 %v4287_v13, %s3210_s16 }
 0x790   : > { %v2100_v32 = vpop.permute.xlu1 %2099  ;;  %v2098_v36 = vpop.permute.xlu0 %2097 }
 0x791   : > { %2147 = vst.msk [vmem:[#allocation3 + $0x8] sm:$0xff] %vm2145_vm6, %v2100_v32  ;;  %2146 = vst.msk [vmem:[#allocation3] sm:$0xff] %vm2145_vm6, %v2098_v36 }
 0x794   : > { %v2116_v40 = vpop.permute.xlu1 %2115  ;;  %v2114_v44 = vpop.permute.xlu0 %2113 }
 0x795   : > { %2155 = vst.msk [vmem:[#allocation3 + $0x48] sm:$0xff] %vm2145_vm6, %v2116_v40  ;;  %2154 = vst.msk [vmem:[#allocation3 + $0x40] sm:$0xff] %vm2145_vm6, %v2114_v44 }
 0x798   : > { %v2118_v1 = vpop.permute.xlu1 %2117  ;;  %v2102_v2 = vpop.permute.xlu0 %2101  ;;  %v2162_v50 = vld [vmem:[#allocation3] sm:$0xff]  ;;  %v2163_v52 = vld [vmem:[#allocation3 + $0x8] sm:$0xff] }
 0x799   : > { %2156 = vst.msk [vmem:[#allocation3 + $0x50] sm:$0xff] %vm2145_vm6, %v2118_v1  ;;  %2148 = vst.msk [vmem:[#allocation3 + $0x10] sm:$0xff] %vm2145_vm6, %v2102_v2  ;;  %2912 = vmatprep.mubr.msk.f32.mxu0 %vm2189_vm7, %v2162_v50 }
 0x79a   : > { %2913 = vmatmul.mubr.msk.f32.vlgmr.msra.gmra.mxu0 %vm2189_vm7, %v2163_v52 }
 0x79c   : > { %v2120_v3 = vpop.permute.xlu1 %2119  ;;  %v2104_v4 = vpop.permute.xlu0 %2103  ;;  %v2170_v5 = vld [vmem:[#allocation3 + $0x40] sm:$0xff]  ;;  %v2171_v7 = vld [vmem:[#allocation3 + $0x48] sm:$0xff] }
 0x79d   : > { %2157 = vst.msk [vmem:[#allocation3 + $0x58] sm:$0xff] %vm2145_vm6, %v2120_v3  ;;  %2149 = vst.msk [vmem:[#allocation3 + $0x18] sm:$0xff] %vm2145_vm6, %v2104_v4  ;;  %2924 = vmatprep.mubr.msk.f32.mxu1 %vm2189_vm7, %v2170_v5 }
 0x79e   : > { %2925 = vmatmul.mubr.msk.f32.vlgmr.msra.gmra.mxu1 %vm2189_vm7, %v2171_v7 }
 0x7a0   : > { %v2122_v8 = vpop.permute.xlu1 %2121  ;;  %v2106_v9 = vpop.permute.xlu0 %2105  ;;  %v2164_v10 = vld [vmem:[#allocation3 + $0x10] sm:$0xff] }
 0x7a1   : > { %v2172_v6 = vld [vmem:[#allocation3 + $0x50] sm:$0xff]  ;;  %2158 = vst.msk [vmem:[#allocation3 + $0x60] sm:$0xff] %vm2145_vm6, %v2122_v8  ;;  %2150 = vst.msk [vmem:[#allocation3 + $0x20] sm:$0xff] %vm2145_vm6, %v2106_v9  ;;  %2915 = vmatprep.mubr.msk.f32.mxu0 %vm2189_vm7, %v2164_v10 }
 0x7a2   : > { %2927 = vmatprep.mubr.msk.f32.mxu1 %vm2189_vm7, %v2172_v6 }
 0x7a4   : > { %v2124_v11 = vpop.permute.xlu1 %2123  ;;  %v2108_v12 = vpop.permute.xlu0 %2107  ;;  %v2165_v13 = vld [vmem:[#allocation3 + $0x18] sm:$0xff] }
 0x7a5   : > { %v2173_v14 = vld [vmem:[#allocation3 + $0x58] sm:$0xff]  ;;  %2159 = vst.msk [vmem:[#allocation3 + $0x68] sm:$0xff] %vm2145_vm6, %v2124_v11  ;;  %2151 = vst.msk [vmem:[#allocation3 + $0x28] sm:$0xff] %vm2145_vm6, %v2108_v12  ;;  %2916 = vmatmul.mubr.msk.f32.gmra.mxu0 %vm2189_vm7, %v2165_v13 }
 0x7a6   : > { %2928 = vmatmul.mubr.msk.f32.gmra.mxu1 %vm2189_vm7, %v2173_v14 }
 0x7a8   : > { %v2126_v15 = vpop.permute.xlu1 %2125  ;;  %v2110_v16 = vpop.permute.xlu0 %2109  ;;  %v2166_v17 = vld [vmem:[#allocation3 + $0x20] sm:$0xff] }
 0x7a9   : > { %v2174_v18 = vld [vmem:[#allocation3 + $0x60] sm:$0xff]  ;;  %2160 = vst.msk [vmem:[#allocation3 + $0x70] sm:$0xff] %vm2145_vm6, %v2126_v15  ;;  %2152 = vst.msk [vmem:[#allocation3 + $0x30] sm:$0xff] %vm2145_vm6, %v2110_v16  ;;  %2918 = vmatprep.mubr.msk.f32.mxu0 %vm2189_vm7, %v2166_v17 }
 0x7aa   : > { %2930 = vmatprep.mubr.msk.f32.mxu1 %vm2189_vm7, %v2174_v18 }
 0x7ac   : > { %v2128_v19 = vpop.permute.xlu1 %2127  ;;  %v2112_v20 = vpop.permute.xlu0 %2111  ;;  %v2167_v21 = vld [vmem:[#allocation3 + $0x28] sm:$0xff] }
 0x7ad   : > { %v2175_v22 = vld [vmem:[#allocation3 + $0x68] sm:$0xff]  ;;  %2161 = vst.msk [vmem:[#allocation3 + $0x78] sm:$0xff] %vm2145_vm6, %v2128_v19  ;;  %2153 = vst.msk [vmem:[#allocation3 + $0x38] sm:$0xff] %vm2145_vm6, %v2112_v20  ;;  %2919 = vmatmul.mubr.msk.f32.gmra.mxu0 %vm2189_vm7, %v2167_v21 }
 0x7ae   : > { %2931 = vmatmul.mubr.msk.f32.gmra.mxu1 %vm2189_vm7, %v2175_v22 }
 0x7b0   : > { %v2168_v25 = vld [vmem:[#allocation3 + $0x30] sm:$0xff] }
 0x7b1   : > { %v2176_v26 = vld [vmem:[#allocation3 + $0x70] sm:$0xff]  ;;  %2921 = vmatprep.mubr.msk.f32.mxu0 %vm2189_vm7, %v2168_v25 }
 0x7b2   : > { %2933 = vmatprep.mubr.msk.f32.mxu1 %vm2189_vm7, %v2176_v26 }
 0x7b4   : > { %v2169_v29 = vld [vmem:[#allocation3 + $0x38] sm:$0xff] }
 0x7b5   : > { %v2177_v30 = vld [vmem:[#allocation3 + $0x78] sm:$0xff]  ;;  %2922 = vmatmul.mubr.msk.f32.gmra.mxu0 %vm2189_vm7, %v2169_v29 }
 0x7b6   : > { %2934 = vmatmul.mubr.msk.f32.gmra.mxu1 %vm2189_vm7, %v2177_v30 }
 0x85a   : > { %v2914_v34 = vpop.f32.mrf.mxu0 }
 0x85b   : > { %v2310_v37 = vadd.f32 %v2914_v34, %v2631_v33 }
 0x85c   : > { %v2304_v38 = vpop.f32.mrf.mxu0 }
 0x85d   : > { %2384 = vst.msk [vmem:[%s3333_s13 + $0x8] sm:$0xff] %vm2189_vm7, %v2310_v37  ;;  %v2305_v41 = vadd.f32 %v2631_v33, %v2304_v38 }
 0x85e   : > { %v2926_v42 = vpop.f32.mrf.mxu1 }
 0x85f   : > { %2383 = vst.msk [vmem:[%s3333_s13] sm:$0xff] %vm2189_vm7, %v2305_v41  ;;  %v2350_v45 = vadd.f32 %v2926_v42, %v2631_v33 }
 0x860   : > { %v2344_v47 = vpop.f32.mrf.mxu1 }
 0x861   : > { %2392 = vst.msk [vmem:[%s3333_s13 + $0x48] sm:$0xff] %vm2189_vm7, %v2350_v45  ;;  %v2345_v49 = vadd.f32 %v2631_v33, %v2344_v47 }
 0x863   : > { %2391 = vst.msk [vmem:[%s3333_s13 + $0x40] sm:$0xff] %vm2189_vm7, %v2345_v49 }
 0x865   : > { %v2917_v51 = vpop.f32.mrf.mxu0 }
 0x866   : > { %v2929_v53 = vpop.f32.mrf.mxu1  ;;  %v2320_v55 = vadd.f32 %v2917_v51, %v2631_v33 }
 0x867   : > { %v2360_v56 = vadd.f32 %v2929_v53, %v2631_v33  ;;  %v2314_v57 = vpop.f32.mrf.mxu0 }
 0x868   : > { %v2354_v58 = vpop.f32.mrf.mxu1  ;;  %2386 = vst.msk [vmem:[%s3333_s13 + $0x18] sm:$0xff] %vm2189_vm7, %v2320_v55  ;;  %v2315_v54 = vadd.f32 %v2631_v33, %v2314_v57 }
 0x869   : > { %2394 = vst.msk [vmem:[%s3333_s13 + $0x58] sm:$0xff] %vm2189_vm7, %v2360_v56  ;;  %v2355_v59 = vadd.f32 %v2631_v33, %v2354_v58 }
 0x86a   : > { %2385 = vst.msk [vmem:[%s3333_s13 + $0x10] sm:$0xff] %vm2189_vm7, %v2315_v54 }
 0x86b   : > { %2393 = vst.msk [vmem:[%s3333_s13 + $0x50] sm:$0xff] %vm2189_vm7, %v2355_v59 }
 0x86d   : > { %v2920_v60 = vpop.f32.mrf.mxu0 }
 0x86e   : > { %v2932_v63 = vpop.f32.mrf.mxu1  ;;  %v2330_v0 = vadd.f32 %v2920_v60, %v2631_v33 }
 0x86f   : > { %v2370_v61 = vadd.f32 %v2932_v63, %v2631_v33  ;;  %v2324_v62 = vpop.f32.mrf.mxu0 }
 0x870   : > { %v2364_v23 = vpop.f32.mrf.mxu1  ;;  %2388 = vst.msk [vmem:[%s3333_s13 + $0x28] sm:$0xff] %vm2189_vm7, %v2330_v0  ;;  %v2325_v27 = vadd.f32 %v2631_v33, %v2324_v62 }
 0x871   : > { %2396 = vst.msk [vmem:[%s3333_s13 + $0x68] sm:$0xff] %vm2189_vm7, %v2370_v61  ;;  %v2365_v31 = vadd.f32 %v2631_v33, %v2364_v23 }
 0x872   : > { %2387 = vst.msk [vmem:[%s3333_s13 + $0x20] sm:$0xff] %vm2189_vm7, %v2325_v27 }
 0x873   : > { %2395 = vst.msk [vmem:[%s3333_s13 + $0x60] sm:$0xff] %vm2189_vm7, %v2365_v31 }
 0x875   : > { %v2923_v35 = vpop.f32.mrf.mxu0 }
 0x876   : > { %v2935_v39 = vpop.f32.mrf.mxu1  ;;  %v2340_v43 = vadd.f32 %v2923_v35, %v2631_v33 }
 0x877   : > { %v2380_v46 = vadd.f32 %v2935_v39, %v2631_v33  ;;  %v2334_v48 = vpop.f32.mrf.mxu0 }
 0x878   : > { %v2374_v24 = vpop.f32.mrf.mxu1  ;;  %2390 = vst.msk [vmem:[%s3333_s13 + $0x38] sm:$0xff] %vm2189_vm7, %v2340_v43  ;;  %v2335_v28 = vadd.f32 %v2631_v33, %v2334_v48 }
 0x879   : > { %2398 = vst.msk [vmem:[%s3333_s13 + $0x78] sm:$0xff] %vm2189_vm7, %v2380_v46  ;;  %v2375_v32 = vadd.f32 %v2631_v33, %v2374_v24 }
 0x87a   : > { %2389 = vst.msk [vmem:[%s3333_s13 + $0x30] sm:$0xff] %vm2189_vm7, %v2335_v28 }
 0x87b   : > { %2397 = vst.msk [vmem:[%s3333_s13 + $0x70] sm:$0xff] %vm2189_vm7, %v2375_v32 }
 0x87c PF: > { %s2649_s8 = sshll.u32 %s3179_s24, 4  ;;  %s2650_s16 = sshll.u32 %s3183_s25, 6 }
 0x87d   : > { %s2423_s29 = sshll.u32 %s3335_s14, 4  ;;  %s2420_s9 = sadd.s32 %s2650_s16, %s2649_s8  ;;  %s4522_s29 = int_to_ptr.vmem [resolvable:$true] %s2423_s29 }
 0x87e   : > { %s2651_s30 = sshll.u32 %s2420_s9, 7  ;;  %s4594_s20 = sand.u32 1, %s3171_s22  }
 0x87f   : > { %s4527_s13 = scalar_lea.hbm %s4588_s6, %s2651_s30  ;;  %s4531_s17 = scalar_lea.sflag [#allocation5], %s4594_s20 }
 0x880   : > { %s3103_s19 = scalar_lea.vmem %s4522_s29, 2048  ;;  %s3211_s24 = smov [#allocation4]  }
 0x881   : > { %p3104_p4 = scmp.ne.s32.totalorder %s4522_s29, %s3103_s19  ;;  %s3107_s25 = sshll.u32 %s3211_s24, 4  ;;  %s3108_s25 = int_to_ptr.vmem [resolvable:$false] %s3107_s25 }
 0x882   : > { %s3109_s14 = scalar_lea.vmem %s3108_s25, 4096  ;;  %p3110_p7 = scmp.lt.s32.totalorder %s4522_s29, %s3108_s25 }
 0x883   : > { %p3105_p5 = pnand %p3104_p4, %p3300_p3  ;;  %p3111_p9 = scmp.lt.s32.totalorder %s3109_s14, %s3103_s19 }
 0x885   : > { %p3106_p6 = pneg %p3105_p5  ;;  %p3112_p10 = por %p3111_p9, %p3110_p7 }
 0x887   : > { %p3113_p11 = pnand %p3112_p10, %p3106_p6 }
 0x889   : > { %3116 = shalt.err (!%p3113_p11)
}
 0x88a   : > { %s3117_s8 = scalar_lea.hbm %s4527_s13, 2048  ;;  %s3121_s30 = scalar_lea.hbm %s4588_s6, 16384 }
 0x88b   : > { %p3118_p12 = scmp.ne.s32.totalorder %s4527_s13, %s3117_s8  ;;  %p3122_p1 = scmp.lt.s32.totalorder %s4527_s13, %s4588_s6 }
 0x88c   : > { %p3123_p2 = scmp.lt.s32.totalorder %s3121_s30, %s3117_s8 }
 0x88d   : > { %p3119_p13 = pnand %p3118_p12, %p3300_p3 }
 0x88e   : > { %p3124_p4 = por %p3123_p2, %p3122_p1 }
 0x88f   : > { %p3120_p0 = pneg %p3119_p13 }
 0x891   : > { %p3125_p5 = pnand %p3124_p4, %p3120_p0 }
 0x893   : > { %3128 = shalt.err (!%p3125_p5)
}
 0x894   : > { %s3212_s20 = smov 128   ;;  %s3213_s19 = smov 8  }
 0x895   : > { %2952 = dma.vmem_to_hbm [thread:$0]  (%p3300_p3), %s4522_s29, 2048, %s4527_s13, %s4531_s17, %s3212_s20, %s3212_s20, %s3213_s19  }
 0x896 PF: > { %p2958_p6 = scmp.ge.s32.totalorder %s3195_s28, 2  ;;  %s2446_s24 = sand.u32 1, %s3167_s21  }
 0x897   : > { %s2447_s25 = scalar_lea.sflag [#allocation5], %s2446_s24 }
 0x898   : > { %p2955_p7 = pnand %p2958_p6, %p3309_p8 }
 0x89a   : > { %p2956_p9 = pneg %p2955_p7 }
 0x89c   : > { %3162 = dma.done.wait (%p2956_p9), %s2447_s25, 2048  }
 0x89d   : > { %3164 = vsyncadd (%p2956_p9), %s2447_s25, 4294965248  ;;  %s20_s28 = sadd.s32 1, %s3195_s28   ;;  %s4595_s10 = sld [smem:[#allocation7_spill]] }
 0x89e   : > { %p17_p10 = scmp.ge.s32.totalorder %s20_s28, 10   ;;  %s4596_s21 = smov %s3171_s22 }
 0x89f   : > { %s4597_s22 = smov %s3175_s23  ;;  %s4598_s23 = smov %s3318_s15 }
 0x8a0   : > { %s4599_s24 = smov %s3187_s26  ;;  %s4600_s25 = smov %s3191_s27 }
 0x8a1   : > { %s4601_s26 = smov %s4604_s7  ;;  %19 = sbr.rel (!%p17_p10) target bundleno = 5 (0x5), region = 121 }
 0x8a3   : > { %s4602_s27 = smov %s4595_s10 }
 0x8a6   :  { %2452 = vsyncpa [#allocation5], 1 }
 0x8a7   :  { %2454 = vsyncpa [#allocation5 + $0x1], 1 }

</bundles_post_ra>
